<compile_context>
chip_gen: v7x
topology: tpu7x:2x2x1
jax: 0.10.0
libtpu: 0.0.40
codegen_flags: <defaults>
</compile_context>

<pallas_src>
import functools

import jax
import jax.numpy as jnp
from jax.experimental import pallas as pl
from jax.experimental.pallas import tpu as pltpu


def _round_up(x, m):
    return (x + m - 1) // m * m


# ---------------------------------------------------------------------------
# Pallas GEMM kernel: o = relu?(x @ w + b), full-K single shot (no k axis).
# ---------------------------------------------------------------------------
def _matmul_bias_kernel(x_ref, w_ref, b_ref, o_ref, *, apply_relu):
    out = jnp.dot(x_ref[...], w_ref[...], preferred_element_type=jnp.float32)
    out = out + b_ref[...]
    if apply_relu:
        out = jnp.maximum(out, 0.0)
    o_ref[...] = out.astype(o_ref.dtype)


_WEIGHT_TILE_BUDGET = 8 * 1024 * 1024   # bf16 bytes per weight tile (v7x-safe)


def _choose_tn(Kp, Np):
    """Largest 128-multiple tile that divides Np and keeps the weight tile small."""
    max_tn = max(128, _WEIGHT_TILE_BUDGET // (2 * Kp))
    for cand in (1024, 512, 256, 128):
        if cand <= max_tn and cand <= Np and Np % cand == 0:
            return cand
    return 128


def _choose_tm(M):
    if M <= 16:
        return 16      # batch-2 FC layers: don't waste 128 MXU rows
    if M <= 512:
        return 256     # small conv GEMMs: keep >=2 M blocks for megacore
    return 512


def prep_linear(w, b):
    """Pad + bf16-cast a (K, N) weight ONCE (outside the per-forward path)."""
    K, N = w.shape
    Kp = _round_up(K, 128)
    Np = _round_up(N, 128)
    tn = _choose_tn(Kp, Np)
    wp = jnp.pad(w, ((0, Kp - K), (0, Np - N))).astype(jnp.bfloat16)
    bp = jnp.pad(b.reshape(1, -1).astype(jnp.float32), ((0, 0), (0, Np - N)))
    return dict(w=wp, b=bp, K=K, N=N, tn=tn)


def prep_conv(w, b):
    KH, KW, Cin, Cout = w.shape
    lp = prep_linear(w.reshape(KH * KW * Cin, Cout), b)
    lp.update(KH=KH, KW=KW)
    return lp


def matmul_bias(x, lp, *, relu):
    """x: (M, K) -> (M, N) f32 using pre-padded bf16 weights in lp."""
    M, K = x.shape
    assert K == lp['K'], (K, lp['K'])
    Kp, Np = lp['w'].shape
    tn = lp['tn']
    tm = _choose_tm(M)
    Mp = _round_up(M, tm)
    xp = jnp.pad(x, ((0, Mp - M), (0, Kp - K))).astype(jnp.bfloat16)

    out = pl.pallas_call(
        functools.partial(_matmul_bias_kernel, apply_relu=relu),
        out_shape=jax.ShapeDtypeStruct((Mp, Np), jnp.float32),
        grid_spec=pltpu.PrefetchScalarGridSpec(
            num_scalar_prefetch=0,
            grid=(Mp // tm, Np // tn),
            in_specs=[
                pl.BlockSpec((tm, Kp), lambda i, j: (i, 0)),
                pl.BlockSpec((Kp, tn), lambda i, j: (0, j)),
                pl.BlockSpec((1, tn), lambda i, j: (0, j)),
            ],
            out_specs=pl.BlockSpec((tm, tn), lambda i, j: (i, j)),
        ),
        compiler_params=pltpu.CompilerParams(
            dimension_semantics=("parallel", "parallel"),
            vmem_limit_bytes=32 * 1024 * 1024),
    )(xp, lp['w'], lp['b'])
    return out[:M, :lp['N']]


# ---------------------------------------------------------------------------
# Pallas max-pool kernel with fused eval-mode BatchNorm affine epilogue.
# ---------------------------------------------------------------------------
def _maxpool_affine_kernel(x_ref, s_ref, t_ref, o_ref):
    # x_ref: (k*k, 1, Ho*Wo, C); s/t_ref: (1, C); o_ref: (1, Ho*Wo, C)
    m = jnp.max(x_ref[...], axis=0)            # (1, Ho*Wo, C)
    o_ref[...] = m * s_ref[...] + t_ref[...]   # (1,C) broadcasts over Ho*Wo


def maxpool2d(x, scale=None, shift=None, *, k=3, s=2):
    """x: (N,H,W,C) -> (N,Ho,Wo,C); optionally fuses y = max(.)*scale + shift
    (the eval-mode BatchNorm that follows the pool in the reference model)."""
    N, H, W, C = x.shape
    Ho = (H - k) // s + 1
    Wo = (W - k) // s + 1
    if scale is None:
        scale = jnp.ones((1, C), jnp.float32)
        shift = jnp.zeros((1, C), jnp.float32)

    wins = []
    for di in range(k):
        for dj in range(k):
            wins.append(jax.lax.slice(
                x,
                (0, di, dj, 0),
                (N, di + (Ho - 1) * s + 1, dj + (Wo - 1) * s + 1, C),
                (1, s, s, 1)))
    wins = jnp.stack(wins, axis=0).reshape(k * k, N, Ho * Wo, C)

    out = pl.pallas_call(
        _maxpool_affine_kernel,
        out_shape=jax.ShapeDtypeStruct((N, Ho * Wo, C), jnp.float32),
        grid=(N,),
        in_specs=[
            pl.BlockSpec((k * k, 1, Ho * Wo, C), lambda n: (0, n, 0, 0)),
            pl.BlockSpec((1, C), lambda n: (0, 0)),
            pl.BlockSpec((1, C), lambda n: (0, 0)),
        ],
        out_specs=pl.BlockSpec((1, Ho * Wo, C), lambda n: (n, 0, 0)),
        compiler_params=pltpu.CompilerParams(
            dimension_semantics=("parallel",),
            vmem_limit_bytes=32 * 1024 * 1024),
    )(wins, scale, shift)
    return out.reshape(N, Ho, Wo, C)


# ---------------------------------------------------------------------------
# Glue: im2col + conv wrapper.
# ---------------------------------------------------------------------------
def im2col(x, kh, kw, stride=1, pad=0):
    if pad:
        x = jnp.pad(x, ((0, 0), (pad, pad), (pad, pad), (0, 0)))
    N, H, W, C = x.shape
    Ho = (H - kh) // stride + 1
    Wo = (W - kw) // stride + 1
    cols = []
    for i in range(kh):
        for j in range(kw):
            cols.append(jax.lax.slice(
                x,
                (0, i, j, 0),
                (N, i + (Ho - 1) * stride + 1, j + (Wo - 1) * stride + 1, C),
                (1, stride, stride, 1)))
    patches = jnp.concatenate(cols, axis=-1)          # (N, Ho, Wo, kh*kw*C)
    return patches.reshape(N * Ho * Wo, kh * kw * C), (N, Ho, Wo)


def conv2d(x, lp, *, stride=1, pad=0, relu=False):
    patches, (N, Ho, Wo) = im2col(x, lp['KH'], lp['KW'], stride, pad)
    y = matmul_bias(patches, lp, relu=relu)
    return y.reshape(N, Ho, Wo, lp['N'])


# ---------------------------------------------------------------------------
# Parameter init (deterministic, synthetic) + one-time prep + forward.
# ---------------------------------------------------------------------------
def init_params(key, num_class=101):
    ks = jax.random.split(key, 32)
    p = {}

    def conv_w(k, kh, kw, cin, cout):
        return 0.05 * jax.random.normal(k, (kh, kw, cin, cout), jnp.float32)

    p['w1'] = conv_w(ks[0], 11, 11, 3, 48)
    p['b1'] = 0.01 * jax.random.normal(ks[1], (48,), jnp.float32)
    p['w2'] = conv_w(ks[2], 5, 5, 48, 128)
    p['b2'] = 0.01 * jax.random.normal(ks[3], (128,), jnp.float32)
    p['w3'] = conv_w(ks[4], 3, 3, 128, 192)
    p['b3'] = 0.01 * jax.random.normal(ks[5], (192,), jnp.float32)
    p['w4'] = conv_w(ks[6], 3, 3, 192, 192)
    p['b4'] = 0.01 * jax.random.normal(ks[7], (192,), jnp.float32)
    p['w5'] = conv_w(ks[8], 3, 3, 192, 128)
    p['b5'] = 0.01 * jax.random.normal(ks[9], (128,), jnp.float32)

    def bn(kg, kb, km, kv, c):
        gamma = 1.0 + 0.1 * jax.random.normal(kg, (c,), jnp.float32)
        beta = 0.1 * jax.random.normal(kb, (c,), jnp.float32)
        mean = 0.1 * jax.random.normal(km, (c,), jnp.float32)
        var = 1.0 + 0.1 * jax.random.uniform(kv, (c,), jnp.float32)
        return (gamma, beta, mean, var)

    p['bn1'] = bn(ks[10], ks[11], ks[12], ks[13], 48)
    p['bn2'] = bn(ks[14], ks[15], ks[16], ks[17], 128)

    p['fc1_w'] = 0.01 * jax.random.normal(ks[18], (6 * 6 * 128, 2048), jnp.float32)
    p['fc1_b'] = jnp.zeros((2048,), jnp.float32)
    p['fc2_w'] = 0.01 * jax.random.normal(ks[19], (2048, 2048), jnp.float32)
    p['fc2_b'] = jnp.zeros((2048,), jnp.float32)
    p['fc3_w'] = 0.01 * jax.random.normal(ks[20], (2048, num_class), jnp.float32)
    p['fc3_b'] = jnp.zeros((num_class,), jnp.float32)
    return p


def prepare_params(p, eps=1e-5):
    """One-time weight prep: pad+bf16-cast GEMM weights, precompute BN scale/shift."""
    pr = {}
    pr['c1'] = prep_conv(p['w1'], p['b1'])
    pr['c2'] = prep_conv(p['w2'], p['b2'])
    pr['c3'] = prep_conv(p['w3'], p['b3'])
    pr['c4'] = prep_conv(p['w4'], p['b4'])
    pr['c5'] = prep_conv(p['w5'], p['b5'])
    for name, bn in (('bn1', p['bn1']), ('bn2', p['bn2'])):
        gamma, beta, mean, var = bn
        s = gamma / jnp.sqrt(var + eps)
        t = beta - mean * s
        pr[name + '_s'] = s.reshape(1, -1).astype(jnp.float32)
        pr[name + '_t'] = t.reshape(1, -1).astype(jnp.float32)
    pr['fc1'] = prep_linear(p['fc1_w'], p['fc1_b'])
    pr['fc2'] = prep_linear(p['fc2_w'], p['fc2_b'])
    pr['fc3'] = prep_linear(p['fc3_w'], p['fc3_b'])
    return pr


def model_forward(x_nchw, pr):
    # NCHW -> NHWC
    x = jnp.transpose(x_nchw, (0, 2, 3, 1)).astype(jnp.float32)

    # features (ReLU fused into conv epilogue; BN fused into pool epilogue,
    # applied exactly where PyTorch applies it: after the pool, before the
    # next conv's zero padding).
    x = conv2d(x, pr['c1'], relu=True)                 # (N, 58, 58, 48)
    x = maxpool2d(x, pr['bn1_s'], pr['bn1_t'])         # (N, 28, 28, 48) + BN1
    x = conv2d(x, pr['c2'], pad=2, relu=True)          # (N, 28, 28, 128)
    x = maxpool2d(x, pr['bn2_s'], pr['bn2_t'])         # (N, 13, 13, 128) + BN2
    x = conv2d(x, pr['c3'], pad=1, relu=True)          # (N, 13, 13, 192)
    x = conv2d(x, pr['c4'], pad=1, relu=True)          # (N, 13, 13, 192)
    x = conv2d(x, pr['c5'], pad=1, relu=True)          # (N, 13, 13, 128)
    x = maxpool2d(x)                                   # (N, 6, 6, 128)

    # flatten in PyTorch (N, C, H, W) order
    x = jnp.transpose(x, (0, 3, 1, 2)).reshape(x.shape[0], -1)   # (N, 4608)

    # classifier (eval mode: Dropout(0.5) == identity)
    # TODO(synk): training-mode dropout (stateful RNG mask) not implemented.
    x = matmul_bias(x, pr['fc1'], relu=True)
    x = matmul_bias(x, pr['fc2'], relu=True)
    x = matmul_bias(x, pr['fc3'], relu=False)
    return x


if __name__ == "__main__":
    key = jax.random.PRNGKey(0)
    k_in, k_par = jax.random.split(key)
    # Input size chosen so the feature extractor yields exactly 6x6x128,
    # matching nn.Linear(6*6*128, 2048): 68 -> 58 -> 28 -> 28 -> 13 -> 13 -> 6.
    x = jax.random.normal(k_in, (2, 3, 68, 68), dtype=jnp.float32)
    params = init_params(k_par, num_class=101)
    prepped = prepare_params(params)          # one-time pad/cast of all weights

    out = model_forward(x, prepped)
    out = jax.block_until_ready(out)
    assert out.shape == (2, 101), out.shape
    assert bool(jnp.all(jnp.isfinite(out)))
    print("KERNEL_OK")
</pallas_src>

<mosaic_0001>
module attributes {stable_mosaic.version = 11 : i64} {
  func.func @_matmul_bias_kernel(%arg0: i32, %arg1: i32, %arg2: memref<512x384xbf16, #tpu.memory_space<vmem>>, %arg3: memref<384x128xbf16, #tpu.memory_space<vmem>>, %arg4: memref<1x128xf32, #tpu.memory_space<vmem>>, %arg5: memref<512x128xf32, #tpu.memory_space<vmem>>) attributes {dimension_semantics = [#tpu.dimension_semantics<parallel>, #tpu.dimension_semantics<parallel>], iteration_bounds = array<i64: 14, 1>, scalar_prefetch = 0 : i64, scratch_operands = 0 : i64, tpu.core_type = #tpu.core_type<tc>, window_params = [{transform_indices = @transform_0, window_bounds = array<i64: 512, 384>}, {transform_indices = @transform_1, window_bounds = array<i64: 384, 128>}, {transform_indices = @transform_2, window_bounds = array<i64: 1, 128>}, {transform_indices = @transform_3, window_bounds = array<i64: 512, 128>}]} {
    %c0 = arith.constant 0 : index
    %c0_0 = arith.constant 0 : index
    %0 = vector.load %arg2[%c0, %c0_0] : memref<512x384xbf16, #tpu.memory_space<vmem>>, vector<512x384xbf16>
    %c0_1 = arith.constant 0 : index
    %c0_2 = arith.constant 0 : index
    %1 = vector.load %arg3[%c0_1, %c0_2] : memref<384x128xbf16, #tpu.memory_space<vmem>>, vector<384x128xbf16>
    %cst = arith.constant dense<0.000000e+00> : vector<512x128xf32>
    %2 = tpu.matmul %0, %1, %cst {dimension_numbers = #tpu.dot_dimension_numbers<[1], [0], [0], [1], [0, 0, 1, 1], [], []>} : vector<512x384xbf16>, vector<384x128xbf16>, vector<512x128xf32> -> vector<512x128xf32>
    %c0_3 = arith.constant 0 : index
    %c0_4 = arith.constant 0 : index
    %3 = vector.load %arg4[%c0_3, %c0_4] : memref<1x128xf32, #tpu.memory_space<vmem>>, vector<1x128xf32>
    %4 = vector.broadcast %3 : vector<1x128xf32> to vector<512x128xf32>
    %5 = arith.addf %2, %4 : vector<512x128xf32>
    %cst_5 = arith.constant 0.000000e+00 : f32
    %6 = vector.broadcast %cst_5 : f32 to vector<512x128xf32>
    %7 = arith.maximumf %5, %6 : vector<512x128xf32>
    %c0_6 = arith.constant 0 : index
    %c0_7 = arith.constant 0 : index
    %8 = vector.load %arg5[%c0_6, %c0_7] : memref<512x128xf32, #tpu.memory_space<vmem>>, vector<512x128xf32>
    tpu.vector_store %arg5[%c0_6, %c0_7], %7 {strides = array<i32>} : memref<512x128xf32, #tpu.memory_space<vmem>>, vector<512x128xf32>,
    return
  }
  func.func @transform_0(%arg0: i32, %arg1: i32) -> (i32, i32) {
    %c0_i32 = arith.constant 0 : i32
    %c0_i32_0 = arith.constant 0 : i32
    return %arg0, %c0_i32 : i32, i32
  }
  func.func @transform_1(%arg0: i32, %arg1: i32) -> (i32, i32) {
    %c0_i32 = arith.constant 0 : i32
    %c0_i32_0 = arith.constant 0 : i32
    return %c0_i32, %arg1 : i32, i32
  }
  func.func @transform_2(%arg0: i32, %arg1: i32) -> (i32, i32) {
    %c0_i32 = arith.constant 0 : i32
    %c0_i32_0 = arith.constant 0 : i32
    return %c0_i32, %arg1 : i32, i32
  }
  func.func @transform_3(%arg0: i32, %arg1: i32) -> (i32, i32) {
    %c0_i32 = arith.constant 0 : i32
    return %arg0, %arg1 : i32, i32
  }
}

</mosaic_0001>

<bundles_post_ra>
// kernel: tpu_custom_call.1
= control target key start
LH: loop header
LB: loop body
LE: loop exit
PB: predicated region body
PF: predicated region fallthrough
CT: control target
= control target key end

     0   :  { %8 = vsyncpa [#allocation3], 0  ;;  %s3291_s0 = inlined_call_operand.hbm [shape: bf16[7168,384], index: 0, kind: input, shape index: {}]   ;;  %s3292_s1 = inlined_call_operand.hbm [shape: bf16[384,128], index: 1, kind: input, shape index: {}]   ;;  %s3293_s2 = inlined_call_operand.hbm [shape: f32[1,128], index: 2, kind: input, shape index: {}]   ;;  %s3294_s3 = inlined_call_operand.hbm [shape: f32[7168,128], index: 3, kind: output, shape index: {}]  }
   0x1   :  { %10 = vsyncpa [#allocation3 + $0x1], 0 }
   0x2   :  { %11 = vsyncpa [#allocation6], 0 }
   0x3   :  { %12 = vsyncpa [#allocation4], 0 }
   0x4   :  { %14 = vsyncpa [#allocation4 + $0x1], 0  ;;  %s2656_s12 = smov 0   ;;  %s2658_s13 = smov 0  }
   0x5   :  { %s2660_s14 = smov 0   ;;  %s2662_s15 = smov 0  }
   0x6   :  { %s2664_s16 = smov 0   ;;  %s2666_s17 = smov 0  }
   0x7 LB: > { %s1914_s18 = sadd.s32 4294967295, %s2623_s17   ;;  %s1915_s19 = sadd.s32 4294967294, %s2623_s17   ;;  %s2623_s17 = sphi %s2666_s17, %s20_s17   ;;  %s2619_s16 = sphi %s2664_s16, %s3316_s16   ;;  %s2615_s15 = sphi %s2662_s15, %s3315_s15   ;;  %s2611_s14 = sphi %s2660_s14, %s3314_s14   ;;  %s2607_s13 = sphi %s2658_s13, %s3313_s13   ;;  %s2603_s12 = sphi %s2656_s12, %s3312_s12  }
   0x8   : > { %p52_p0 = scmp.ne.s32.totalorder %s2607_s13, %s2603_s12  ;;  %p2690_p1 = scmp.eq.s32.totalorder %s1914_s18, 0 }
   0x9   : > { %p2694_p2 = scmp.eq.s32.totalorder %s1914_s18, 13  ;;  %p136_p3 = scmp.eq.s32.totalorder %s1915_s19, 13 }
   0xa   : > { %s3299_s20 = scalar_select %p2690_p1, 1, 0 }
   0xb   : > { %s3300_s21 = scalar_select %p2694_p2, 1, 0 }
   0xc   : > { %p2700_p4 = por %p2690_p1, %p52_p0  ;;  %p1916_p5 = scmp.ge.s32.totalorder %s2623_s17, 1 }
   0xd   : > { %p2705_p6 = por %p136_p3, %p52_p0  ;;  %p143_p7 = scmp.lt.s32.totalorder %s2623_s17, 15 }
   0xe   : > { %s3301_s22 = scalar_select %p2700_p4, 1, 0 }
   0xf   : > { %s3302_s23 = scalar_select %p2705_p6, 1, 0 }
  0x10   : > { %p2710_p8 = pnand %p1916_p5, %p143_p7  ;;  %s2625_s25 = smov [#allocation5]  }
  0x11   : > { %s157_s26 = sshll.u32 %s2625_s25, 4  ;;  %s2626_s28 = smov [#allocation7]   ;;  %s158_s26 = int_to_ptr.vmem [resolvable:$true] %s157_s26 }
  0x12   : > { %s3303_s24 = scalar_select %p2710_p8, 1, 0 }
  0x13   : > { %p2221_p9 = pneg %p2710_p8  ;;  %s173_s29 = sshll.u32 %s2626_s28, 4  ;;  %s2722_s29 = int_to_ptr.vmem [resolvable:$true] %s173_s29 }
  0x14   : > { %s2451_s5 = scalar_lea.hbm %s3292_s1, 3072 }
  0x15   : > { %p2718_p10 = pnand %p2221_p9, %p2690_p1  ;;  %p2452_p11 = scmp.ne.s32.totalorder %s3292_s1, %s2451_s5 }
  0x16   : > { %p2458_p3 = scmp.lt.u32.totalorder %s2451_s5, %s3292_s1 }
  0x17   : > { %p2453_p12 = pneg %p2718_p10 }
  0x19   : > { %p2454_p13 = pnand %p2453_p12, %p2452_p11 }
  0x1b   : > { %p2455_p0 = pneg %p2454_p13 }
  0x1d   : > { %p2460_p5 = pnand %p2458_p3, %p2455_p0 }
  0x1f   : > { %2463 = shalt.err (!%p2460_p5)
}
  0x20   : > { %s2464_s10 = scalar_lea.vmem %s158_s26, 3072  ;;  %p2472_p1 = scmp.lt.s32.totalorder %s158_s26, %s158_s26 }
  0x21   : > { %p2465_p7 = scmp.ne.s32.totalorder %s158_s26, %s2464_s10  ;;  %p2473_p4 = scmp.lt.s32.totalorder %s2464_s10, %s2464_s10 }
  0x23   : > { %p2467_p9 = pnand %p2465_p7, %p2453_p12  ;;  %p2474_p8 = por %p2473_p4, %p2472_p1 }
  0x25   : > { %p2468_p6 = pneg %p2467_p9 }
  0x27   : > { %p2475_p2 = pnand %p2474_p8, %p2468_p6 }
  0x29   : > { %2478 = shalt.err (!%p2475_p2)
}
  0x2a   : > { %s2627_s11 = smov 64   ;;  %s2628_s18 = smov 4  }
  0x2b   : > { %2224 = dma.hbm_to_vmem [thread:$0]  (!%p2718_p10), %s3292_s1, 3072, %s158_s26, [#allocation6], %s2627_s11, %s2627_s11, %s2628_s18  }
  0x2c   : > { %s2479_s4 = scalar_lea.hbm %s3293_s2, 16 }
  0x2d   : > { %p2480_p11 = scmp.ne.s32.totalorder %s3293_s2, %s2479_s4  ;;  %p2486_p4 = scmp.lt.u32.totalorder %s2479_s4, %s3293_s2 }
  0x2f   : > { %p2482_p1 = pnand %p2480_p11, %p2453_p12 }
  0x31   : > { %p2483_p2 = pneg %p2482_p1 }
  0x33   : > { %p2488_p6 = pnand %p2486_p4, %p2483_p2 }
  0x35   : > { %2491 = shalt.err (!%p2488_p6)
}
  0x36   : > { %s2492_s26 = scalar_lea.vmem %s2722_s29, 16  ;;  %s2499_s9 = scalar_lea.vmem %s2722_s29, 32 }
  0x37   : > { %p2493_p8 = scmp.ne.s32.totalorder %s2722_s29, %s2492_s26  ;;  %p2500_p3 = scmp.lt.s32.totalorder %s2722_s29, %s2722_s29 }
  0x38   : > { %p2501_p5 = scmp.lt.s32.totalorder %s2499_s9, %s2492_s26 }
  0x39   : > { %p2495_p13 = pnand %p2493_p8, %p2453_p12 }
  0x3a   : > { %p2502_p7 = por %p2501_p5, %p2500_p3 }
  0x3b   : > { %p2496_p0 = pneg %p2495_p13 }
  0x3d   : > { %p2503_p9 = pnand %p2502_p7, %p2496_p0 }
  0x3f   : > { %2506 = shalt.err (!%p2503_p9)
}
  0x40   : > { %2227 = dma.hbm_to_vmem [thread:$0]  (!%p2718_p10), %s3293_s2, 16, %s2722_s29, [#allocation6]  }
  0x41   : > { %s32_s18 = sadd.s32 1, %s2619_s16  ;;  %s39_s19 = sadd.s32 1, %s2611_s14 }
  0x42   : > { %p34_p12 = scmp.ge.s32.totalorder %s32_s18, 14  ;;  %p46_p11 = scmp.ne.s32.totalorder %s2611_s14, %s2607_s13 }
  0x43   : > { %p47_p1 = scmp.eq.s32.totalorder %s2623_s17, 0  ;;  %p2238_p2 = scmp.lt.s32.totalorder %s2623_s17, 14 }
  0x44   : > { %s3318_s18 = smov (%p34_p12, %s32_s18), 0  ;;  %p3305_p6 = scmp.ne.s32.totalorder %s3300_s21, 0 }
  0x45   : > { %p48_p4 = por %p47_p1, %p46_p11  ;;  %s36_s25 = ssub.s32 %s2619_s16, %s3318_s18 }
  0x46   : > { %p2782_p8 = por %p3305_p6, %p46_p11  ;;  %s184_s28 = sand.u32 1, %s2611_s14  }
  0x47   : > { %p37_p13 = scmp.eq.s32.totalorder %s36_s25, 0  ;;  %s2206_s29 = smul.u32 768, %s184_s28 }
  0x48   : > { %p2789_p10 = pnand %p2238_p2, %p48_p4  ;;  %s2207_s5 = smul.u32 12288, %s2619_s16 }
  0x49   : > { %s2794_s4 = scalar_select %p37_p13, %s2611_s14, %s39_s19  }
  0x4a   : > { %s188_s6 = scalar_lea.vmem [#allocation2], %s2206_s29  ;;  %s2800_s26 = scalar_lea.hbm %s3291_s0, %s2207_s5 }
  0x4b   : > { %s196_s7 = sshll.u32 %s188_s6, 4  ;;  %s2804_s9 = scalar_lea.sflag [#allocation3], %s184_s28  ;;  %s2802_s7 = int_to_ptr.vmem [resolvable:$true] %s196_s7 }
  0x4c   : > { %s2507_s10 = scalar_lea.hbm %s2800_s26, 12288  ;;  %p2509_p3 = pneg %p2789_p10 }
  0x4d   : > { %p2508_p0 = scmp.ne.s32.totalorder %s2800_s26, %s2507_s10  ;;  %s2512_s25 = scalar_lea.hbm %s3291_s0, 172032 }
  0x4e   : > { %p2513_p9 = scmp.lt.u32.totalorder %s2800_s26, %s3291_s0  ;;  %p2514_p12 = scmp.lt.u32.totalorder %s2512_s25, %s2507_s10 }
  0x4f   : > { %p2510_p5 = pnand %p2509_p3, %p2508_p0  ;;  %p2516_p1 = scmp.lt.u32.totalorder %s2507_s10, %s2800_s26 }
  0x50   : > { %p2515_p11 = por %p2514_p12, %p2513_p9 }
  0x51   : > { %p2511_p7 = pneg %p2510_p5 }
  0x52   : > { %p2517_p2 = por %p2516_p1, %p2515_p11 }
  0x54   : > { %p2518_p4 = pnand %p2517_p2, %p2511_p7 }
  0x56   : > { %2521 = shalt.err (!%p2518_p4)
}
  0x57   : > { %s2522_s28 = scalar_lea.vmem %s2802_s7, 12288  ;;  %s2629_s6 = smov [#allocation2]  }
  0x58   : > { %p2523_p6 = scmp.ne.s32.totalorder %s2802_s7, %s2522_s28  ;;  %s2527_s21 = sshll.u32 %s2629_s6, 4  ;;  %s2528_s21 = int_to_ptr.vmem [resolvable:$false] %s2527_s21 }
  0x59   : > { %s2529_s8 = scalar_lea.vmem %s2528_s21, 24576  ;;  %p2530_p5 = scmp.lt.s32.totalorder %s2802_s7, %s2528_s21 }
  0x5a   : > { %p2525_p13 = pnand %p2523_p6, %p2509_p3  ;;  %p2531_p9 = scmp.lt.s32.totalorder %s2529_s8, %s2522_s28 }
  0x5c   : > { %p2526_p0 = pneg %p2525_p13  ;;  %p2532_p12 = por %p2531_p9, %p2530_p5 }
  0x5e   : > { %p2533_p11 = pnand %p2532_p12, %p2526_p0 }
  0x60   : > { %2536 = shalt.err (!%p2533_p11)
}
  0x61   : > { %s2630_s10 = smov 192   ;;  %s2631_s11 = smov 12  }
  0x62   : > { %2231 = dma.hbm_to_vmem [thread:$0]  (!%p2789_p10), %s2800_s26, 12288, %s2802_s7, %s2804_s9, %s2630_s10, %s2630_s10, %s2631_s11  }
  0x63   : > { %p3308_p3 = scmp.ne.s32.totalorder %s3303_s24, 0 }
  0x64   : > { %s2835_s19 = sand.u32 (!%p3308_p3), 1, %s2607_s13   ;;  %p3309_p7 = scmp.ne.s32.totalorder (!%p3308_p3), %s3301_s22, 0 }
  0x65   : > { %208 = sbr.rel (%p3308_p3) target bundleno = 596 (0x254), region = 32  ;;  %s211_s29 = scalar_lea.sflag (!%p3308_p3), [#allocation3], %s2835_s19 }
  0x66   : > { %s2208_s25 = smul.u32 (!%p3308_p3), 768, %s2835_s19 }
  0x68   : > { %s2839_s5 = scalar_lea.vmem (!%p3308_p3), [#allocation2], %s2208_s25 }
  0x6c   : > { %2590 = dma.done.wait (%p3309_p7), %s211_s29, 12288  }
  0x6d   : > { %2592 = vsyncadd (%p3309_p7), %s211_s29, 4294955008  ;;  %p3310_p10 = scmp.ne.s32.totalorder %s3299_s20, 0 }
  0x6f   : > { %2594 = dma.done.wait (%p3310_p10), [#allocation6], 3088  }
  0x70   : > { %2596 = vsyncadd (%p3310_p10), [#allocation6], 4294964208  ;;  %v2632_v0 = vmov 0   ;;  %v2299_v1 = vld [vmem:[#allocation5] sm:$0xff]   ;;  %v2300_v2 = vld [vmem:[#allocation5 + $0x8] sm:$0xff]   ;;  %s1926_s20 = sshll.u32 %s2835_s19, 9 }
  0x71   : > { %1087 = vmatprep.subr.bf16.mxu0 %v2632_v0  ;;  %2174 = vmatprep.subr.bf16.mxu1 %v2632_v0  ;;  %v2301_v3 = vld [vmem:[#allocation5 + $0x10] sm:$0xff]   ;;  %v2302_v4 = vld [vmem:[#allocation5 + $0x18] sm:$0xff]   ;;  %v2303_v5 = vld [vmem:[#allocation5 + $0x20] sm:$0xff]   ;;  %s3050_s22 = scalar_lea.vmem [#allocation8], %s1926_s20  ;;  %s2053_s24 = sshll.u32 %s2615_s15, 13 }
  0x72   : > { %1088 = vmatpush1.bf16.msra.mxu0 %v2299_v1  ;;  %2190 = vmatpush1.bf16.msra.mxu1 %v2299_v1  ;;  %v2317_v6 = vld [vmem:[%s2839_s5 + $0x4] ss:$12 sps:$4 sm:$0xff]   ;;  %v2304_v7 = vld [vmem:[#allocation5 + $0x28] sm:$0xff]   ;;  %v2306_v10 = vld [vmem:[#allocation5 + $0x38] sm:$0xff]   ;;  %s1808_s30 = sshll.u32 %s3050_s22, 4  ;;  %s3237_s9 = scalar_lea.hbm %s3294_s3, %s2053_s24  ;;  %s3239_s30 = int_to_ptr.vmem [resolvable:$true] %s1808_s30 }
  0x73   : > { %1089 = vmatprep.subr.bf16.mxu0 %v2632_v0  ;;  %2175 = vmatprep.subr.bf16.mxu1 %v2632_v0  ;;  %v2320_v8 = vld [vmem:[%s2839_s5 + $0x244] ss:$12 sps:$4 sm:$0xff]   ;;  %v2308_v12 = vld [vmem:[#allocation5 + $0x48] sm:$0xff]   ;;  %v2310_v14 = vld [vmem:[#allocation5 + $0x58] sm:$0xff]   ;;  %s1794_s15 = scalar_lea.sflag [#allocation4], %s2835_s19  ;;  %s2537_s28 = scalar_lea.vmem %s3239_s30, 8192 }
  0x74   : > { %1119 = vmatprep.mubr.bf16.mxu0 %v2317_v6  ;;  %1311 = vmatprep.mubr.bf16.mxu1 %v2320_v8  ;;  %v2305_v9 = vld [vmem:[#allocation5 + $0x30] sm:$0xff]   ;;  %v2307_v11 = vld [vmem:[#allocation5 + $0x40] sm:$0xff]   ;;  %v2312_v16 = vld [vmem:[#allocation5 + $0x68] sm:$0xff]   ;;  %p2538_p1 = scmp.ne.s32.totalorder %s3239_s30, %s2537_s28  ;;  %s2633_s6 = smov [#allocation8]  }
  0x75   : > { %v2309_v13 = vld [vmem:[#allocation5 + $0x50] sm:$0xff]   ;;  %v2311_v15 = vld [vmem:[#allocation5 + $0x60] sm:$0xff]   ;;  %v2314_v18 = vld [vmem:[#allocation5 + $0x78] sm:$0xff]   ;;  %s2541_s21 = sshll.u32 %s2633_s6, 4  ;;  %s2542_s21 = int_to_ptr.vmem [resolvable:$false] %s2541_s21 }
  0x76   : > { %1090 = vmatpush1.bf16.msra.mxu0 %v2300_v2  ;;  %2191 = vmatpush1.bf16.msra.mxu1 %v2300_v2  ;;  %v2313_v17 = vld [vmem:[#allocation5 + $0x70] sm:$0xff]   ;;  %v2321_v19 = vld [vmem:[#allocation5 + $0x80] sm:$0xff]   ;;  %v2322_v22 = vld [vmem:[%s2839_s5 + $0x1c] ss:$12 sps:$4 sm:$0xff]   ;;  %p2539_p2 = pnand %p2538_p1, %p2782_p8  ;;  %s2543_s8 = scalar_lea.vmem %s2542_s21, 16384 }
  0x77   : > { %1091 = vmatprep.subr.bf16.mxu0 %v2632_v0  ;;  %2176 = vmatprep.subr.bf16.mxu1 %v2632_v0  ;;  %v2315_v20 = vld [vmem:[%s2839_s5] ss:$12 sps:$4 sm:$0xff]   ;;  %v2324_v23 = vld [vmem:[%s2839_s5 + $0x25c] ss:$12 sps:$4 sm:$0xff]   ;;  %v2335_v25 = vld [vmem:[#allocation5 + $0x90] sm:$0xff]   ;;  %p2544_p6 = scmp.lt.s32.totalorder %s3239_s30, %s2542_s21  ;;  %p2545_p13 = scmp.lt.s32.totalorder %s2543_s8, %s2537_s28 }
  0x78   : > { %v2318_v21 = vld [vmem:[%s2839_s5 + $0x240] ss:$12 sps:$4 sm:$0xff]   ;;  %v2326_v26 = vld [vmem:[%s2839_s5 + $0x18] ss:$12 sps:$4 sm:$0xff]   ;;  %v2333_v31 = vld [vmem:[%s2839_s5 + $0x30] ss:$12 sps:$4 sm:$0xff]   ;;  %p2540_p4 = pneg %p2539_p2 }
  0x79   : > { %v2328_v24 = vld [vmem:[#allocation5 + $0x88] sm:$0xff]   ;;  %v2327_v27 = vld [vmem:[%s2839_s5 + $0x258] ss:$12 sps:$4 sm:$0xff]   ;;  %v2329_v28 = vld [vmem:[%s2839_s5 + $0x34] ss:$12 sps:$4 sm:$0xff]   ;;  %p2546_p0 = por %p2545_p13, %p2544_p6 }
  0x7a   : > { %1092 = vmatpush1.bf16.msra.mxu0 %v2301_v3  ;;  %2192 = vmatpush1.bf16.msra.mxu1 %v2301_v3  ;;  %v2331_v29 = vld [vmem:[%s2839_s5 + $0x274] ss:$12 sps:$4 sm:$0xff]   ;;  %v2342_v30 = vld [vmem:[#allocation5 + $0x98] sm:$0xff]   ;;  %v2356_v36 = vld [vmem:[#allocation5 + $0xa8] sm:$0xff]  }
  0x7b   : > { %1093 = vmatprep.subr.bf16.mxu0 %v2632_v0  ;;  %2177 = vmatprep.subr.bf16.mxu1 %v2632_v0  ;;  %v2349_v32 = vld [vmem:[#allocation5 + $0xa0] sm:$0xff]   ;;  %v2334_v33 = vld [vmem:[%s2839_s5 + $0x270] ss:$12 sps:$4 sm:$0xff]   ;;  %v2336_v34 = vld [vmem:[%s2839_s5 + $0x4c] ss:$12 sps:$4 sm:$0xff]   ;;  %p2547_p5 = pnand %p2546_p0, %p2540_p4 }
  0x7c   : > { %v2338_v35 = vld [vmem:[%s2839_s5 + $0x28c] ss:$12 sps:$4 sm:$0xff]   ;;  %v2340_v37 = vld [vmem:[%s2839_s5 + $0x48] ss:$12 sps:$4 sm:$0xff]   ;;  %v2343_v39 = vld [vmem:[%s2839_s5 + $0x64] ss:$12 sps:$4 sm:$0xff]  }
  0x7d   : > { %v2341_v38 = vld [vmem:[%s2839_s5 + $0x288] ss:$12 sps:$4 sm:$0xff]   ;;  %v2345_v40 = vld [vmem:[%s2839_s5 + $0x2a4] ss:$12 sps:$4 sm:$0xff]   ;;  %v2370_v42 = vld [vmem:[#allocation5 + $0xb8] sm:$0xff]  }
  0x7e   : > { %1094 = vmatpush1.bf16.msra.mxu0 %v2302_v4  ;;  %2193 = vmatpush1.bf16.msra.mxu1 %v2302_v4  ;;  %v2363_v41 = vld [vmem:[#allocation5 + $0xb0] sm:$0xff]   ;;  %v2347_v43 = vld [vmem:[%s2839_s5 + $0x60] ss:$12 sps:$4 sm:$0xff]   ;;  %v2350_v45 = vld [vmem:[%s2839_s5 + $0x7c] ss:$12 sps:$4 sm:$0xff]  }
  0x7f   : > { %1095 = vmatprep.subr.bf16.mxu0 %v2632_v0  ;;  %2178 = vmatprep.subr.bf16.mxu1 %v2632_v0  ;;  %v2348_v44 = vld [vmem:[%s2839_s5 + $0x2a0] ss:$12 sps:$4 sm:$0xff]   ;;  %v2352_v46 = vld [vmem:[%s2839_s5 + $0x2bc] ss:$12 sps:$4 sm:$0xff]   ;;  %v2354_v47 = vld [vmem:[%s2839_s5 + $0x78] ss:$12 sps:$4 sm:$0xff]  }
  0x80   : > { %v2355_v48 = vld [vmem:[%s2839_s5 + $0x2b8] ss:$12 sps:$4 sm:$0xff]   ;;  %v2357_v49 = vld [vmem:[%s2839_s5 + $0x94] ss:$12 sps:$4 sm:$0xff]   ;;  %v2361_v51 = vld [vmem:[%s2839_s5 + $0x90] ss:$12 sps:$4 sm:$0xff]  }
  0x81   : > { %v2359_v50 = vld [vmem:[%s2839_s5 + $0x2d4] ss:$12 sps:$4 sm:$0xff]   ;;  %v2362_v52 = vld [vmem:[%s2839_s5 + $0x2d0] ss:$12 sps:$4 sm:$0xff]   ;;  %v2364_v53 = vld [vmem:[%s2839_s5 + $0xac] ss:$12 sps:$4 sm:$0xff]  }
  0x82   : > { %1096 = vmatpush1.bf16.msra.mxu0 %v2303_v5  ;;  %2194 = vmatpush1.bf16.msra.mxu1 %v2303_v5  ;;  %v2366_v54 = vld [vmem:[%s2839_s5 + $0x2ec] ss:$12 sps:$4 sm:$0xff]   ;;  %v2368_v55 = vld [vmem:[%s2839_s5 + $0xa8] ss:$12 sps:$4 sm:$0xff]   ;;  %v2371_v57 = vld [vmem:[%s2839_s5 + $0xc4] ss:$12 sps:$4 sm:$0xff]  }
  0x83   : > { %1097 = vmatprep.subr.bf16.mxu0 %v2632_v0  ;;  %2179 = vmatprep.subr.bf16.mxu1 %v2632_v0  ;;  %v2369_v56 = vld [vmem:[%s2839_s5 + $0x2e8] ss:$12 sps:$4 sm:$0xff]   ;;  %v2374_v59 = vld [vmem:[%s2839_s5 + $0xc0] ss:$12 sps:$4 sm:$0xff]   ;;  %v2378_v62 = vld [vmem:[%s2839_s5 + $0x38] ss:$12 sps:$4 sm:$0xff]  }
  0x84   : > { %v2373_v58 = vld [vmem:[%s2839_s5 + $0x8] ss:$12 sps:$4 sm:$0xff]   ;;  %v2375_v60 = vld [vmem:[%s2839_s5 + $0x20] ss:$12 sps:$4 sm:$0xff]   ;;  %v2379_v63 = vld [vmem:[%s2839_s5 + $0xd8] ss:$12 sps:$4 sm:$0xff]  }
  0x85   : > { %v2376_v61 = vld [vmem:[%s2839_s5 + $0xdc] ss:$12 sps:$4 sm:$0xff]   ;;  %v2381_v1 = vld [vmem:[%s2839_s5 + $0xf4] ss:$12 sps:$4 sm:$0xff]   ;;  %v2386_v5 = vld [vmem:[%s2839_s5 + $0x10c] ss:$12 sps:$4 sm:$0xff]  }
  0x86   : > { %1098 = vmatpush1.bf16.msra.mxu0 %v2304_v7  ;;  %2195 = vmatpush1.bf16.msra.mxu1 %v2304_v7  ;;  %v2383_v2 = vld [vmem:[%s2839_s5 + $0x68] ss:$12 sps:$4 sm:$0xff]   ;;  %v2384_v3 = vld [vmem:[%s2839_s5 + $0xf0] ss:$12 sps:$4 sm:$0xff]   ;;  %v2385_v4 = vld [vmem:[%s2839_s5 + $0x80] ss:$12 sps:$4 sm:$0xff]  }
  0x87   : > { %1099 = vmatprep.subr.bf16.mxu0 %v2632_v0  ;;  %2180 = vmatprep.subr.bf16.mxu1 %v2632_v0  ;;  %v2388_v6 = vld [vmem:[%s2839_s5 + $0x98] ss:$12 sps:$4 sm:$0xff]   ;;  %v2389_v7 = vld [vmem:[%s2839_s5 + $0x108] ss:$12 sps:$4 sm:$0xff]   ;;  %v2390_v8 = vld [vmem:[%s2839_s5 + $0xb0] ss:$12 sps:$4 sm:$0xff]  }
  0x8a   : > { %1100 = vmatpush1.bf16.msra.mxu0 %v2305_v9  ;;  %2196 = vmatpush1.bf16.msra.mxu1 %v2305_v9  ;;  %v2391_v9 = vld [vmem:[%s2839_s5 + $0x124] ss:$12 sps:$4 sm:$0xff]  }
  0x8b   : > { %1101 = vmatprep.subr.bf16.mxu0 %v2632_v0  ;;  %2181 = vmatprep.subr.bf16.mxu1 %v2632_v0 }
  0x8e   : > { %1102 = vmatpush1.bf16.msra.mxu0 %v2306_v10  ;;  %2197 = vmatpush1.bf16.msra.mxu1 %v2306_v10  ;;  %v2393_v10 = vld [vmem:[%s2839_s5 + $0xc8] ss:$12 sps:$4 sm:$0xff]  }
  0x8f   : > { %1103 = vmatprep.subr.bf16.mxu0 %v2632_v0  ;;  %2182 = vmatprep.subr.bf16.mxu1 %v2632_v0 }
  0x92   : > { %1104 = vmatpush1.bf16.msra.mxu0 %v2307_v11  ;;  %2198 = vmatpush1.bf16.msra.mxu1 %v2307_v11  ;;  %v2394_v11 = vld [vmem:[%s2839_s5 + $0x120] ss:$12 sps:$4 sm:$0xff]  }
  0x93   : > { %1105 = vmatprep.subr.bf16.mxu0 %v2632_v0  ;;  %2183 = vmatprep.subr.bf16.mxu1 %v2632_v0 }
  0x96   : > { %1106 = vmatpush1.bf16.msra.mxu0 %v2308_v12  ;;  %2199 = vmatpush1.bf16.msra.mxu1 %v2308_v12  ;;  %v2395_v12 = vld [vmem:[%s2839_s5 + $0xe0] ss:$12 sps:$4 sm:$0xff]  }
  0x97   : > { %1107 = vmatprep.subr.bf16.mxu0 %v2632_v0  ;;  %2184 = vmatprep.subr.bf16.mxu1 %v2632_v0 }
  0x9a   : > { %1108 = vmatpush1.bf16.msra.mxu0 %v2309_v13  ;;  %2200 = vmatpush1.bf16.msra.mxu1 %v2309_v13  ;;  %v2396_v13 = vld [vmem:[%s2839_s5 + $0x13c] ss:$12 sps:$4 sm:$0xff]  }
  0x9b   : > { %1109 = vmatprep.subr.bf16.mxu0 %v2632_v0  ;;  %2185 = vmatprep.subr.bf16.mxu1 %v2632_v0 }
  0x9e   : > { %1110 = vmatpush1.bf16.msra.mxu0 %v2310_v14  ;;  %2201 = vmatpush1.bf16.msra.mxu1 %v2310_v14  ;;  %v2398_v14 = vld [vmem:[%s2839_s5 + $0xf8] ss:$12 sps:$4 sm:$0xff]  }
  0x9f   : > { %1111 = vmatprep.subr.bf16.mxu0 %v2632_v0  ;;  %2186 = vmatprep.subr.bf16.mxu1 %v2632_v0 }
  0xa2   : > { %1112 = vmatpush1.bf16.msra.mxu0 %v2311_v15  ;;  %2202 = vmatpush1.bf16.msra.mxu1 %v2311_v15  ;;  %v2399_v15 = vld [vmem:[%s2839_s5 + $0x138] ss:$12 sps:$4 sm:$0xff]  }
  0xa3   : > { %1113 = vmatprep.subr.bf16.mxu0 %v2632_v0  ;;  %2187 = vmatprep.subr.bf16.mxu1 %v2632_v0 }
  0xa6   : > { %1114 = vmatpush1.bf16.msra.mxu0 %v2312_v16  ;;  %2203 = vmatpush1.bf16.msra.mxu1 %v2312_v16  ;;  %v2400_v16 = vld [vmem:[%s2839_s5 + $0x110] ss:$12 sps:$4 sm:$0xff]  }
  0xa7   : > { %1115 = vmatprep.subr.bf16.mxu0 %v2632_v0  ;;  %2188 = vmatprep.subr.bf16.mxu1 %v2632_v0 }
  0xaa   : > { %1116 = vmatpush1.bf16.msra.mxu0 %v2313_v17  ;;  %2204 = vmatpush1.bf16.msra.mxu1 %v2313_v17  ;;  %v2401_v17 = vld [vmem:[%s2839_s5 + $0x154] ss:$12 sps:$4 sm:$0xff]  }
  0xab   : > { %1117 = vmatprep.subr.bf16.mxu0 %v2632_v0  ;;  %2189 = vmatprep.subr.bf16.mxu1 %v2632_v0  ;;  %v2380_v0 = vld [vmem:[%s2839_s5 + $0x50] ss:$12 sps:$4 sm:$0xff]  }
  0xae   : > { %1118 = vmatpush1.bf16.msra.mxu0 %v2314_v18  ;;  %2205 = vmatpush1.bf16.msra.mxu1 %v2314_v18  ;;  %v2403_v18 = vld [vmem:[%s2839_s5 + $0x128] ss:$12 sps:$4 sm:$0xff]  }
  0xaf   : > { %2094 = vmatprep.subr.bf16.mxu1 %v2321_v19 }
  0xb1   : > { %1120 = vmatmul.mubr.bf16.vlgmr.msra.gmra.mrb[0].mxu0 %v2315_v20  ;;  %1312 = vmatmul.mubr.bf16.vlgmr.msra.gmra.mrb[0].mxu1 %v2318_v21  ;;  %v2405_v20 = vld [vmem:[%s2839_s5 + $0x140] ss:$12 sps:$4 sm:$0xff]  }
  0xb2   : > { %2095 = vmatpush3.bf16.msra.mxu1 %v2321_v19  ;;  %1127 = vmatprep.mubr.bf16.mxu0 %v2322_v22  ;;  %v2404_v19 = vld [vmem:[%s2839_s5 + $0x150] ss:$12 sps:$4 sm:$0xff]   ;;  %v2406_v21 = vld [vmem:[%s2839_s5 + $0x16c] ss:$12 sps:$4 sm:$0xff]  }
  0xb3   : > { %1319 = vmatprep.mubr.bf16.mxu1 %v2324_v23  ;;  %2096 = vmatprep.subr.bf16.mxu1 %v2328_v24  ;;  %v2408_v22 = vld [vmem:[%s2839_s5 + $0x158] ss:$12 sps:$4 sm:$0xff]   ;;  %v2409_v23 = vld [vmem:[%s2839_s5 + $0x168] ss:$12 sps:$4 sm:$0xff]  }
  0xb6   : > { %2097 = vmatpush3.bf16.msra.mxu1 %v2328_v24  ;;  %v2410_v24 = vld [vmem:[%s2839_s5 + $0x170] ss:$12 sps:$4 sm:$0xff]  }
  0xb7   : > { %2098 = vmatprep.subr.bf16.mxu1 %v2335_v25 }
  0xb9   : > { %1128 = vmatmul.mubr.bf16.gmra.mrb[4].mxu0 %v2326_v26  ;;  %1320 = vmatmul.mubr.bf16.gmra.mrb[4].mxu1 %v2327_v27  ;;  %v2413_v26 = vld [vmem:[%s2839_s5 + $0x188] ss:$12 sps:$4 sm:$0xff]   ;;  %v2414_v27 = vld [vmem:[%s2839_s5 + $0x180] ss:$12 sps:$4 sm:$0xff]  }
  0xba   : > { %1135 = vmatprep.mubr.bf16.mxu0 %v2329_v28  ;;  %1327 = vmatprep.mubr.bf16.mxu1 %v2331_v29  ;;  %v2415_v28 = vld [vmem:[%s2839_s5 + $0x1a0] ss:$12 sps:$4 sm:$0xff]   ;;  %v2416_v29 = vld [vmem:[%s2839_s5 + $0x19c] ss:$12 sps:$4 sm:$0xff]  }
  0xbb   : > { %2099 = vmatpush3.bf16.msra.mxu1 %v2335_v25  ;;  %v2411_v25 = vld [vmem:[%s2839_s5 + $0x184] ss:$12 sps:$4 sm:$0xff]  }
  0xbc   : > { %2100 = vmatprep.subr.bf16.mxu1 %v2342_v30 }
  0xbf   : > { %2101 = vmatpush3.bf16.msra.mxu1 %v2342_v30  ;;  %v2418_v30 = vld [vmem:[%s2839_s5 + $0x1b8] ss:$12 sps:$4 sm:$0xff]  }
  0xc0   : > { %2102 = vmatprep.subr.bf16.mxu1 %v2349_v32 }
  0xc1   : > { %1136 = vmatmul.mubr.bf16.gmra.mrb[8].mxu0 %v2333_v31  ;;  %1328 = vmatmul.mubr.bf16.gmra.mrb[8].mxu1 %v2334_v33  ;;  %v2419_v31 = vld [vmem:[%s2839_s5 + $0x198] ss:$12 sps:$4 sm:$0xff]   ;;  %v2421_v33 = vld [vmem:[%s2839_s5 + $0x1b4] ss:$12 sps:$4 sm:$0xff]  }
  0xc2   : > { %1143 = vmatprep.mubr.bf16.mxu0 %v2336_v34  ;;  %1335 = vmatprep.mubr.bf16.mxu1 %v2338_v35  ;;  %v2423_v34 = vld [vmem:[%s2839_s5 + $0x1e8] ss:$12 sps:$4 sm:$0xff]   ;;  %v2424_v35 = vld [vmem:[%s2839_s5 + $0x1b0] ss:$12 sps:$4 sm:$0xff]  }
  0xc3   : > { %2103 = vmatpush3.bf16.msra.mxu1 %v2349_v32  ;;  %v2420_v32 = vld [vmem:[%s2839_s5 + $0x1d0] ss:$12 sps:$4 sm:$0xff]  }
  0xc4   : > { %2104 = vmatprep.subr.bf16.mxu1 %v2356_v36 }
  0xc7   : > { %2105 = vmatpush3.bf16.msra.mxu1 %v2356_v36  ;;  %v2425_v36 = vld [vmem:[%s2839_s5 + $0x200] ss:$12 sps:$4 sm:$0xff]  }
  0xc8   : > { %2106 = vmatprep.subr.bf16.mxu1 %v2363_v41 }
  0xc9   : > { %1144 = vmatmul.mubr.bf16.gmra.mrb[12].mxu0 %v2340_v37  ;;  %1336 = vmatmul.mubr.bf16.gmra.mrb[12].mxu1 %v2341_v38  ;;  %v2426_v37 = vld [vmem:[%s2839_s5 + $0x1cc] ss:$12 sps:$4 sm:$0xff]  }
  0xca   : > { %1151 = vmatprep.mubr.bf16.mxu0 %v2343_v39  ;;  %1343 = vmatprep.mubr.bf16.mxu1 %v2345_v40  ;;  %v2428_v38 = vld [vmem:[%s2839_s5 + $0x218] ss:$12 sps:$4 sm:$0xff]   ;;  %v2429_v39 = vld [vmem:[%s2839_s5 + $0x1c8] ss:$12 sps:$4 sm:$0xff]   ;;  %v2430_v40 = vld [vmem:[%s2839_s5 + $0x230] ss:$12 sps:$4 sm:$0xff]  }
  0xcb   : > { %2107 = vmatpush3.bf16.msra.mxu1 %v2363_v41  ;;  %v2431_v41 = vld [vmem:[%s2839_s5 + $0x1e4] ss:$12 sps:$4 sm:$0xff]  }
  0xcc   : > { %2108 = vmatprep.subr.bf16.mxu1 %v2370_v42 }
  0xcf   : > { %2109 = vmatpush3.bf16.msra.mxu1 %v2370_v42  ;;  %v2433_v42 = vld [vmem:[%s2839_s5 + $0x248] ss:$12 sps:$4 sm:$0xff]  }
  0xd1   : > { %1152 = vmatmul.mubr.bf16.gmra.mrb[16].mxu0 %v2347_v43  ;;  %1344 = vmatmul.mubr.bf16.gmra.mrb[16].mxu1 %v2348_v44  ;;  %v2434_v43 = vld [vmem:[%s2839_s5 + $0x1e0] ss:$12 sps:$4 sm:$0xff]  }
  0xd2   : > { %1159 = vmatprep.mubr.bf16.mxu0 %v2350_v45  ;;  %1351 = vmatprep.mubr.bf16.mxu1 %v2352_v46  ;;  %v2435_v44 = vld [vmem:[%s2839_s5 + $0x260] ss:$12 sps:$4 sm:$0xff]   ;;  %v2436_v45 = vld [vmem:[%s2839_s5 + $0x1fc] ss:$12 sps:$4 sm:$0xff]   ;;  %v2438_v46 = vld [vmem:[%s2839_s5 + $0x278] ss:$12 sps:$4 sm:$0xff]  }
  0xd9   : > { %1160 = vmatmul.mubr.bf16.gmra.mrb[20].mxu0 %v2354_v47  ;;  %1352 = vmatmul.mubr.bf16.gmra.mrb[20].mxu1 %v2355_v48  ;;  %v2439_v47 = vld [vmem:[%s2839_s5 + $0x1f8] ss:$12 sps:$4 sm:$0xff]   ;;  %v2440_v48 = vld [vmem:[%s2839_s5 + $0x290] ss:$12 sps:$4 sm:$0xff]  }
  0xda   : > { %1167 = vmatprep.mubr.bf16.mxu0 %v2357_v49  ;;  %1359 = vmatprep.mubr.bf16.mxu1 %v2359_v50  ;;  %v2441_v49 = vld [vmem:[%s2839_s5 + $0x214] ss:$12 sps:$4 sm:$0xff]  }
  0xdb   : > { %v2443_v50 = vld [vmem:[%s2839_s5 + $0x2a8] ss:$12 sps:$4 sm:$0xff]  }
  0xe1   : > { %1168 = vmatmul.mubr.bf16.gmra.mrb[24].mxu0 %v2361_v51  ;;  %1360 = vmatmul.mubr.bf16.gmra.mrb[24].mxu1 %v2362_v52  ;;  %v2444_v51 = vld [vmem:[%s2839_s5 + $0x210] ss:$12 sps:$4 sm:$0xff]   ;;  %v2445_v52 = vld [vmem:[%s2839_s5 + $0x2c0] ss:$12 sps:$4 sm:$0xff]  }
  0xe2   : > { %1175 = vmatprep.mubr.bf16.mxu0 %v2364_v53  ;;  %1367 = vmatprep.mubr.bf16.mxu1 %v2366_v54  ;;  %v2446_v53 = vld [vmem:[%s2839_s5 + $0x22c] ss:$12 sps:$4 sm:$0xff]  }
  0xe3   : > { %v2448_v54 = vld [vmem:[%s2839_s5 + $0x2d8] ss:$12 sps:$4 sm:$0xff]  }
  0xe9   : > { %1176 = vmatmul.mubr.bf16.gmra.mrb[28].mxu0 %v2368_v55  ;;  %1368 = vmatmul.mubr.bf16.gmra.mrb[28].mxu1 %v2369_v56  ;;  %v2449_v55 = vld [vmem:[%s2839_s5 + $0x228] ss:$12 sps:$4 sm:$0xff]   ;;  %v2450_v56 = vld [vmem:[%s2839_s5 + $0x2f0] ss:$12 sps:$4 sm:$0xff]  }
  0xea   : > { %1183 = vmatprep.mubr.bf16.mxu0 %v2371_v57  ;;  %2110 = vmatprep.mubr.bf16.mxu1 %v2373_v58 }
  0xf1   : > { %1184 = vmatmul.mubr.bf16.gmra.mrb[32].mxu0 %v2374_v59  ;;  %2111 = vmatmul.mubr.bf16.vlgmr.msra.gmra.mrb[32].mxu1 %v2375_v60 }
  0xf2   : > { %1191 = vmatprep.mubr.bf16.mxu0 %v2376_v61  ;;  %2114 = vmatprep.mubr.bf16.mxu1 %v2378_v62 }
  0xf9   : > { %1192 = vmatmul.mubr.bf16.gmra.mrb[36].mxu0 %v2379_v63  ;;  %2115 = vmatmul.mubr.bf16.gmra.mrb[36].mxu1 %v2380_v0 }
  0xfa   : > { %1199 = vmatprep.mubr.bf16.mxu0 %v2381_v1  ;;  %2118 = vmatprep.mubr.bf16.mxu1 %v2383_v2 }
 0x101   : > { %1200 = vmatmul.mubr.bf16.gmra.mrb[40].mxu0 %v2384_v3  ;;  %2119 = vmatmul.mubr.bf16.gmra.mrb[40].mxu1 %v2385_v4 }
 0x102   : > { %1207 = vmatprep.mubr.bf16.mxu0 %v2386_v5  ;;  %2122 = vmatprep.mubr.bf16.mxu1 %v2388_v6 }
 0x109   : > { %1208 = vmatmul.mubr.bf16.gmra.mrb[44].mxu0 %v2389_v7  ;;  %2123 = vmatmul.mubr.bf16.gmra.mrb[44].mxu1 %v2390_v8 }
 0x10a   : > { %1215 = vmatprep.mubr.bf16.mxu0 %v2391_v9  ;;  %2126 = vmatprep.mubr.bf16.mxu1 %v2393_v10 }
 0x111   : > { %1216 = vmatmul.mubr.bf16.gmra.mrb[48].mxu0 %v2394_v11  ;;  %2127 = vmatmul.mubr.bf16.gmra.mrb[48].mxu1 %v2395_v12 }
 0x112   : > { %1223 = vmatprep.mubr.bf16.mxu0 %v2396_v13  ;;  %2130 = vmatprep.mubr.bf16.mxu1 %v2398_v14 }
 0x119   : > { %1224 = vmatmul.mubr.bf16.gmra.mrb[52].mxu0 %v2399_v15  ;;  %2131 = vmatmul.mubr.bf16.gmra.mrb[52].mxu1 %v2400_v16 }
 0x11a   : > { %1231 = vmatprep.mubr.bf16.mxu0 %v2401_v17  ;;  %2134 = vmatprep.mubr.bf16.mxu1 %v2403_v18 }
 0x121   : > { %1232 = vmatmul.mubr.bf16.gmra.mrb[56].mxu0 %v2404_v19  ;;  %2135 = vmatmul.mubr.bf16.gmra.mrb[56].mxu1 %v2405_v20 }
 0x122   : > { %1239 = vmatprep.mubr.bf16.mxu0 %v2406_v21  ;;  %2138 = vmatprep.mubr.bf16.mxu1 %v2408_v22 }
 0x129   : > { %1240 = vmatmul.mubr.bf16.gmra.mrb[60].mxu0 %v2409_v23  ;;  %2139 = vmatmul.mubr.bf16.gmra.mrb[60].mxu1 %v2410_v24 }
 0x12a   : > { %1247 = vmatprep.mubr.bf16.mxu0 %v2411_v25  ;;  %2142 = vmatprep.mubr.bf16.mxu1 %v2413_v26 }
 0x131   : > { %1248 = vmatmul.mubr.bf16.gmra.mrb[64].mxu0 %v2414_v27  ;;  %2143 = vmatmul.mubr.bf16.gmra.mrb[64].mxu1 %v2415_v28 }
 0x132   : > { %1255 = vmatprep.mubr.bf16.mxu0 %v2416_v29  ;;  %2146 = vmatprep.mubr.bf16.mxu1 %v2418_v30 }
 0x139   : > { %1256 = vmatmul.mubr.bf16.gmra.mrb[68].mxu0 %v2419_v31  ;;  %2147 = vmatmul.mubr.bf16.gmra.mrb[68].mxu1 %v2420_v32 }
 0x13a   : > { %1263 = vmatprep.mubr.bf16.mxu0 %v2421_v33  ;;  %2150 = vmatprep.mubr.bf16.mxu1 %v2423_v34 }
 0x141   : > { %1264 = vmatmul.mubr.bf16.gmra.mrb[72].mxu0 %v2424_v35  ;;  %2151 = vmatmul.mubr.bf16.gmra.mrb[72].mxu1 %v2425_v36 }
 0x142   : > { %1271 = vmatprep.mubr.bf16.mxu0 %v2426_v37  ;;  %2154 = vmatprep.mubr.bf16.mxu1 %v2428_v38 }
 0x149   : > { %1272 = vmatmul.mubr.bf16.gmra.mrb[76].mxu0 %v2429_v39  ;;  %2155 = vmatmul.mubr.bf16.gmra.mrb[76].mxu1 %v2430_v40 }
 0x14a   : > { %1279 = vmatprep.mubr.bf16.mxu0 %v2431_v41  ;;  %2158 = vmatprep.mubr.bf16.mxu1 %v2433_v42 }
 0x151   : > { %1280 = vmatmul.mubr.bf16.gmra.mrb[80].mxu0 %v2434_v43  ;;  %2159 = vmatmul.mubr.bf16.gmra.mrb[80].mxu1 %v2435_v44 }
 0x152   : > { %1287 = vmatprep.mubr.bf16.mxu0 %v2436_v45  ;;  %2162 = vmatprep.mubr.bf16.mxu1 %v2438_v46 }
 0x159   : > { %1288 = vmatmul.mubr.bf16.gmra.mrb[84].mxu0 %v2439_v47  ;;  %2163 = vmatmul.mubr.bf16.gmra.mrb[84].mxu1 %v2440_v48 }
 0x15a   : > { %1295 = vmatprep.mubr.bf16.mxu0 %v2441_v49  ;;  %2166 = vmatprep.mubr.bf16.mxu1 %v2443_v50 }
 0x161   : > { %1296 = vmatmul.mubr.bf16.gmra.mrb[88].mxu0 %v2444_v51  ;;  %2167 = vmatmul.mubr.bf16.gmra.mrb[88].mxu1 %v2445_v52 }
 0x162   : > { %1303 = vmatprep.mubr.bf16.mxu0 %v2446_v53  ;;  %2170 = vmatprep.mubr.bf16.mxu1 %v2448_v54 }
 0x169   : > { %1304 = vmatmul.mubr.bf16.gmra.mrb[92].mxu0 %v2449_v55  ;;  %2171 = vmatmul.mubr.bf16.gmra.mrb[92].mxu1 %v2450_v56 }
 0x184   : > { %v2977_v57 = vpop.f32.mrb[0].mxu0  ;;  %v2979_v58 = vpop.f32.mrb[0].mxu1 }
 0x185   : > { %v1123_v59 = vpop.f32.mrb[1].mxu0  ;;  %v1315_v60 = vpop.f32.mrb[1].mxu1 }
 0x186   : > { %v2981_v61 = vpop.f32.mrb[2].mxu0  ;;  %v2983_v62 = vpop.f32.mrb[2].mxu1  ;;  %v3037_v59 = vld [vmem:[#allocation7] ss:$0 sm:$0xff] }
 0x187   : > { %v1126_v63 = vpop.f32.mrb[3].mxu0  ;;  %v1318_v0 = vpop.f32.mrb[3].mxu1 }
 0x188   : > { %v1122_v63 = vadd.f32 %v3037_v59, %v2977_v57 }
 0x18c   : > { %v1129_v1 = vpop.f32.mrb[4].mxu0  ;;  %v2985_v2 = vpop.f32.mrb[4].mxu1 }
 0x18d   : > { %v1131_v3 = vpop.f32.mrb[5].mxu0  ;;  %v1323_v4 = vpop.f32.mrb[5].mxu1  ;;  %v1130_v60 = vadd.f32 %v3037_v59, %v1129_v1 }
 0x18e   : > { %v1132_v5 = vpop.f32.mrb[6].mxu0  ;;  %v2987_v6 = vpop.f32.mrb[6].mxu1 }
 0x18f   : > { %v1134_v7 = vpop.f32.mrb[7].mxu0  ;;  %v1326_v8 = vpop.f32.mrb[7].mxu1  ;;  %v1133_v4 = vadd.f32 %v3037_v59, %v1132_v5 }
 0x194   : > { %v2989_v9 = vpop.f32.mrb[8].mxu0  ;;  %v2991_v10 = vpop.f32.mrb[8].mxu1 }
 0x195   : > { %v1139_v11 = vpop.f32.mrb[9].mxu0  ;;  %v1331_v12 = vpop.f32.mrb[9].mxu1 }
 0x196   : > { %v2993_v13 = vpop.f32.mrb[10].mxu0  ;;  %v2995_v14 = vpop.f32.mrb[10].mxu1  ;;  %v1125_v12 = vadd.f32 %v3037_v59, %v2981_v61 }
 0x197   : > { %v1142_v15 = vpop.f32.mrb[11].mxu0  ;;  %v1334_v16 = vpop.f32.mrb[11].mxu1 }
 0x19c   : > { %v2997_v17 = vpop.f32.mrb[12].mxu0  ;;  %v2999_v18 = vpop.f32.mrb[12].mxu1 }
 0x19d   : > { %v1147_v19 = vpop.f32.mrb[13].mxu0  ;;  %v1339_v20 = vpop.f32.mrb[13].mxu1 }
 0x19e   : > { %v3001_v21 = vpop.f32.mrb[14].mxu0  ;;  %v3003_v22 = vpop.f32.mrb[14].mxu1 }
 0x19f   : > { %v1150_v23 = vpop.f32.mrb[15].mxu0  ;;  %v1342_v24 = vpop.f32.mrb[15].mxu1 }
 0x1a4   : > { %v3005_v25 = vpop.f32.mrb[16].mxu0  ;;  %v3007_v26 = vpop.f32.mrb[16].mxu1 }
 0x1a5   : > { %v1155_v27 = vpop.f32.mrb[17].mxu0  ;;  %v1347_v28 = vpop.f32.mrb[17].mxu1 }
 0x1a6   : > { %v3009_v29 = vpop.f32.mrb[18].mxu0  ;;  %v3011_v30 = vpop.f32.mrb[18].mxu1  ;;  %v1146_v28 = vadd.f32 %v3037_v59, %v2997_v17  ;;  %v1141_v17 = vadd.f32 %v3037_v59, %v2993_v13  ;;  %v1154_v13 = vadd.f32 %v3037_v59, %v3005_v25 }
 0x1a7   : > { %v1158_v31 = vpop.f32.mrb[19].mxu0  ;;  %v1350_v32 = vpop.f32.mrb[19].mxu1 }
 0x1a8   : > { %v1138_v31 = vadd.f32 %v3037_v59, %v2989_v9 }
 0x1ac   : > { %v3013_v33 = vpop.f32.mrb[20].mxu0  ;;  %v3015_v34 = vpop.f32.mrb[20].mxu1 }
 0x1ad   : > { %v1163_v35 = vpop.f32.mrb[21].mxu0  ;;  %v1355_v36 = vpop.f32.mrb[21].mxu1 }
 0x1ae   : > { %v3017_v37 = vpop.f32.mrb[22].mxu0  ;;  %v3019_v38 = vpop.f32.mrb[22].mxu1  ;;  %v1149_v36 = vadd.f32 %v3037_v59, %v3001_v21 }
 0x1af   : > { %v1166_v39 = vpop.f32.mrb[23].mxu0  ;;  %v1358_v40 = vpop.f32.mrb[23].mxu1 }
 0x1b4   : > { %v3021_v41 = vpop.f32.mrb[24].mxu0  ;;  %v3023_v42 = vpop.f32.mrb[24].mxu1 }
 0x1b5   : > { %v1171_v43 = vpop.f32.mrb[25].mxu0  ;;  %v1363_v44 = vpop.f32.mrb[25].mxu1 }
 0x1b6   : > { %v3025_v45 = vpop.f32.mrb[26].mxu0  ;;  %v3027_v46 = vpop.f32.mrb[26].mxu1 }
 0x1b7   : > { %v1174_v47 = vpop.f32.mrb[27].mxu0  ;;  %v1366_v48 = vpop.f32.mrb[27].mxu1 }
 0x1bc   : > { %v3029_v49 = vpop.f32.mrb[28].mxu0  ;;  %v3031_v50 = vpop.f32.mrb[28].mxu1 }
 0x1bd   : > { %v1179_v51 = vpop.f32.mrb[29].mxu0  ;;  %v1371_v52 = vpop.f32.mrb[29].mxu1 }
 0x1be   : > { %v3033_v53 = vpop.f32.mrb[30].mxu0  ;;  %v3035_v54 = vpop.f32.mrb[30].mxu1 }
 0x1bf   : > { %v1182_v55 = vpop.f32.mrb[31].mxu0  ;;  %v1374_v56 = vpop.f32.mrb[31].mxu1 }
 0x1c4   : > { %v3043_v0 = vpop.f32.mrb[32].mxu0  ;;  %v2112_v3 = vpop.f32.mrb[32].mxu1 }
 0x1c5   : > { %v1419_v7 = vadd.f32 %v2112_v3, %v1130_v60  ;;  %v1187_v8 = vpop.f32.mrb[33].mxu0  ;;  %v1410_v11 = vpop.f32.mrb[33].mxu1  ;;  %v1162_v3 = vadd.f32 %v3037_v59, %v3013_v33  ;;  %v1157_v33 = vadd.f32 %v3037_v59, %v3009_v29  ;;  %v1170_v29 = vadd.f32 %v3037_v59, %v3021_v41 }
 0x1c6   : > { %v1411_v15 = vadd.f32 %v1410_v11, %v1122_v63  ;;  %v3048_v16 = vpop.f32.mrb[34].mxu0  ;;  %v2113_v19 = vpop.f32.mrb[34].mxu1  ;;  %v1165_v8 = vadd.f32 %v3037_v59, %v3017_v37 }
 0x1c7   : > { %v1667_v1 = vmax.f32 %v1419_v7, 0.0  ;;  %v1422_v20 = vadd.f32 %v2113_v19, %v1133_v4  ;;  %v1190_v23 = vpop.f32.mrb[35].mxu0  ;;  %v1413_v24 = vpop.f32.mrb[35].mxu1 }
 0x1c8   : > { %v1665_v57 = vmax.f32 %v1411_v15, 0.0  ;;  %v1414_v27 = vadd.f32 %v1413_v24, %v1125_v12 }
 0x1c9   : > { %1731 = vst [vmem:[%s3050_s22 + $0x10] sm:$0xff] %v1667_v1  ;;  %v1668_v5 = vmax.f32 %v1422_v20, 0.0 }
 0x1ca   : > { %1729 = vst [vmem:[%s3050_s22] sm:$0xff] %v1665_v57  ;;  %v1666_v61 = vmax.f32 %v1414_v27, 0.0 }
 0x1cb   : > { %1732 = vst [vmem:[%s3050_s22 + $0x18] sm:$0xff] %v1668_v5 }
 0x1cc   : > { %1730 = vst [vmem:[%s3050_s22 + $0x8] sm:$0xff] %v1666_v61  ;;  %v3060_v32 = vpop.f32.mrb[36].mxu0  ;;  %v2116_v35 = vpop.f32.mrb[36].mxu1 }
 0x1cd   : > { %v1435_v39 = vadd.f32 %v2116_v35, %v1146_v28  ;;  %v1195_v40 = vpop.f32.mrb[37].mxu0  ;;  %v1426_v43 = vpop.f32.mrb[37].mxu1  ;;  %v1178_v28 = vadd.f32 %v3037_v59, %v3029_v49 }
 0x1ce   : > { %v1427_v44 = vadd.f32 %v1426_v43, %v1138_v31  ;;  %v3066_v47 = vpop.f32.mrb[38].mxu0  ;;  %v2117_v9 = vpop.f32.mrb[38].mxu1 }
 0x1cf   : > { %v1671_v48 = vmax.f32 %v1435_v39, 0.0  ;;  %v1438_v51 = vadd.f32 %v2117_v9, %v1149_v36  ;;  %v1198_v52 = vpop.f32.mrb[39].mxu0  ;;  %v1429_v55 = vpop.f32.mrb[39].mxu1  ;;  %v1181_v36 = vadd.f32 %v3037_v59, %v3033_v53 }
 0x1d0   : > { %v1669_v56 = vmax.f32 %v1427_v44, 0.0  ;;  %v1430_v60 = vadd.f32 %v1429_v55, %v1141_v17  ;;  %v1173_v17 = vadd.f32 %v3037_v59, %v3025_v45  ;;  %v1186_v45 = vadd.f32 %v3037_v59, %v3043_v0 }
 0x1d1   : > { %1735 = vst [vmem:[%s3050_s22 + $0x30] sm:$0xff] %v1671_v48  ;;  %v1672_v21 = vmax.f32 %v1438_v51, 0.0 }
 0x1d2   : > { %1733 = vst [vmem:[%s3050_s22 + $0x20] sm:$0xff] %v1669_v56  ;;  %v1670_v63 = vmax.f32 %v1430_v60, 0.0 }
 0x1d3   : > { %1736 = vst [vmem:[%s3050_s22 + $0x38] sm:$0xff] %v1672_v21  ;;  %v1194_v21 = vadd.f32 %v3037_v59, %v3060_v32 }
 0x1d4   : > { %1734 = vst [vmem:[%s3050_s22 + $0x28] sm:$0xff] %v1670_v63  ;;  %v3076_v4 = vpop.f32.mrb[40].mxu0  ;;  %v2120_v7 = vpop.f32.mrb[40].mxu1 }
 0x1d5   : > { %v1451_v11 = vadd.f32 %v2120_v7, %v1162_v3  ;;  %v1203_v12 = vpop.f32.mrb[41].mxu0  ;;  %v1442_v15 = vpop.f32.mrb[41].mxu1 }
 0x1d6   : > { %v1443_v19 = vadd.f32 %v1442_v15, %v1154_v13  ;;  %v3082_v1 = vpop.f32.mrb[42].mxu0  ;;  %v2121_v25 = vpop.f32.mrb[42].mxu1  ;;  %v1197_v13 = vadd.f32 %v3037_v59, %v3066_v47  ;;  %v1189_v12 = vadd.f32 %v3037_v59, %v3048_v16  ;;  %v1202_v16 = vadd.f32 %v3037_v59, %v3076_v4 }
 0x1d7   : > { %v1675_v20 = vmax.f32 %v1451_v11, 0.0  ;;  %v1454_v23 = vadd.f32 %v2121_v25, %v1165_v8  ;;  %v1206_v24 = vpop.f32.mrb[43].mxu0  ;;  %v1445_v57 = vpop.f32.mrb[43].mxu1 }
 0x1d8   : > { %v1673_v27 = vmax.f32 %v1443_v19, 0.0  ;;  %v1446_v5 = vadd.f32 %v1445_v57, %v1157_v33 }
 0x1d9   : > { %1739 = vst [vmem:[%s3050_s22 + $0x50] sm:$0xff] %v1675_v20  ;;  %v1676_v37 = vmax.f32 %v1454_v23, 0.0 }
 0x1da   : > { %1737 = vst [vmem:[%s3050_s22 + $0x40] sm:$0xff] %v1673_v27  ;;  %v1674_v61 = vmax.f32 %v1446_v5, 0.0 }
 0x1db   : > { %1740 = vst [vmem:[%s3050_s22 + $0x58] sm:$0xff] %v1676_v37 }
 0x1dc   : > { %1738 = vst [vmem:[%s3050_s22 + $0x48] sm:$0xff] %v1674_v61  ;;  %v1209_v31 = vpop.f32.mrb[44].mxu0  ;;  %v2124_v35 = vpop.f32.mrb[44].mxu1 }
 0x1dd   : > { %v1467_v39 = vadd.f32 %v2124_v35, %v1178_v28  ;;  %v1211_v40 = vpop.f32.mrb[45].mxu0  ;;  %v1458_v43 = vpop.f32.mrb[45].mxu1  ;;  %v1210_v27 = vadd.f32 %v3037_v59, %v1209_v31 }
 0x1de   : > { %v1459_v49 = vadd.f32 %v1458_v43, %v1170_v29  ;;  %v1212_v44 = vpop.f32.mrb[46].mxu0  ;;  %v2125_v9 = vpop.f32.mrb[46].mxu1 }
 0x1df   : > { %v1679_v41 = vmax.f32 %v1467_v39, 0.0  ;;  %v1470_v48 = vadd.f32 %v2125_v9, %v1181_v36  ;;  %v1214_v51 = vpop.f32.mrb[47].mxu0  ;;  %v1461_v52 = vpop.f32.mrb[47].mxu1  ;;  %v1213_v61 = vadd.f32 %v3037_v59, %v1212_v44  ;;  %v1205_v36 = vadd.f32 %v3037_v59, %v3082_v1 }
 0x1e0   : > { %v1677_v55 = vmax.f32 %v1459_v49, 0.0  ;;  %v1462_v56 = vadd.f32 %v1461_v52, %v1173_v17 }
 0x1e1   : > { %1743 = vst [vmem:[%s3050_s22 + $0x70] sm:$0xff] %v1679_v41  ;;  %v1680_v53 = vmax.f32 %v1470_v48, 0.0 }
 0x1e2   : > { %1741 = vst [vmem:[%s3050_s22 + $0x60] sm:$0xff] %v1677_v55  ;;  %v1678_v60 = vmax.f32 %v1462_v56, 0.0 }
 0x1e3   : > { %1744 = vst [vmem:[%s3050_s22 + $0x78] sm:$0xff] %v1680_v53 }
 0x1e4   : > { %1742 = vst [vmem:[%s3050_s22 + $0x68] sm:$0xff] %v1678_v60  ;;  %v1217_v63 = vpop.f32.mrb[48].mxu0  ;;  %v2128_v3 = vpop.f32.mrb[48].mxu1 }
 0x1e5   : > { %v1483_v7 = vadd.f32 %v2128_v3, %v1194_v21  ;;  %v1219_v8 = vpop.f32.mrb[49].mxu0  ;;  %v1474_v11 = vpop.f32.mrb[49].mxu1  ;;  %v1218_v52 = vadd.f32 %v3037_v59, %v1217_v63 }
 0x1e6   : > { %v1475_v32 = vadd.f32 %v1474_v11, %v1186_v45  ;;  %v1220_v15 = vpop.f32.mrb[50].mxu0  ;;  %v2129_v33 = vpop.f32.mrb[50].mxu1 }
 0x1e7   : > { %v1683_v0 = vmax.f32 %v1483_v7, 0.0  ;;  %v1486_v19 = vadd.f32 %v2129_v33, %v1197_v13  ;;  %v1222_v25 = vpop.f32.mrb[51].mxu0  ;;  %v1477_v20 = vpop.f32.mrb[51].mxu1  ;;  %v1221_v45 = vadd.f32 %v3037_v59, %v1220_v15 }
 0x1e8   : > { %v1681_v23 = vmax.f32 %v1475_v32, 0.0  ;;  %v1478_v24 = vadd.f32 %v1477_v20, %v1189_v12 }
 0x1e9   : > { %1747 = vst [vmem:[%s3050_s22 + $0x90] sm:$0xff] %v1683_v0  ;;  %v1684_v47 = vmax.f32 %v1486_v19, 0.0 }
 0x1ea   : > { %1745 = vst [vmem:[%s3050_s22 + $0x80] sm:$0xff] %v1681_v23  ;;  %v1682_v57 = vmax.f32 %v1478_v24, 0.0 }
 0x1eb   : > { %1748 = vst [vmem:[%s3050_s22 + $0x98] sm:$0xff] %v1684_v47 }
 0x1ec   : > { %1746 = vst [vmem:[%s3050_s22 + $0x88] sm:$0xff] %v1682_v57  ;;  %v1225_v5 = vpop.f32.mrb[52].mxu0  ;;  %v2132_v37 = vpop.f32.mrb[52].mxu1 }
 0x1ed   : > { %v1499_v28 = vadd.f32 %v2132_v37, %v1210_v27  ;;  %v1227_v29 = vpop.f32.mrb[53].mxu0  ;;  %v1490_v35 = vpop.f32.mrb[53].mxu1  ;;  %v1226_v51 = vadd.f32 %v3037_v59, %v1225_v5 }
 0x1ee   : > { %v1491_v39 = vadd.f32 %v1490_v35, %v1202_v16  ;;  %v1228_v31 = vpop.f32.mrb[54].mxu0  ;;  %v2133_v40 = vpop.f32.mrb[54].mxu1 }
 0x1ef   : > { %v1687_v43 = vmax.f32 %v1499_v28, 0.0  ;;  %v1502_v4 = vadd.f32 %v2133_v40, %v1213_v61  ;;  %v1230_v17 = vpop.f32.mrb[55].mxu0  ;;  %v1493_v49 = vpop.f32.mrb[55].mxu1  ;;  %v1229_v56 = vadd.f32 %v3037_v59, %v1228_v31 }
 0x1f0   : > { %v1685_v9 = vmax.f32 %v1491_v39, 0.0  ;;  %v1494_v41 = vadd.f32 %v1493_v49, %v1205_v36 }
 0x1f1   : > { %1751 = vst [vmem:[%s3050_s22 + $0xb0] sm:$0xff] %v1687_v43  ;;  %v1688_v44 = vmax.f32 %v1502_v4, 0.0 }
 0x1f2   : > { %1749 = vst [vmem:[%s3050_s22 + $0xa0] sm:$0xff] %v1685_v9  ;;  %v1686_v48 = vmax.f32 %v1494_v41, 0.0 }
 0x1f3   : > { %1752 = vst [vmem:[%s3050_s22 + $0xb8] sm:$0xff] %v1688_v44 }
 0x1f4   : > { %1750 = vst [vmem:[%s3050_s22 + $0xa8] sm:$0xff] %v1686_v48  ;;  %v1233_v1 = vpop.f32.mrb[56].mxu0  ;;  %v2136_v55 = vpop.f32.mrb[56].mxu1 }
 0x1f5   : > { %v1515_v53 = vadd.f32 %v2136_v55, %v1226_v51  ;;  %v1235_v60 = vpop.f32.mrb[57].mxu0  ;;  %v1506_v21 = vpop.f32.mrb[57].mxu1  ;;  %v1234_v25 = vadd.f32 %v3037_v59, %v1233_v1 }
 0x1f6   : > { %v1507_v3 = vadd.f32 %v1506_v21, %v1218_v52  ;;  %v1236_v13 = vpop.f32.mrb[58].mxu0  ;;  %v2137_v7 = vpop.f32.mrb[58].mxu1 }
 0x1f7   : > { %v1691_v8 = vmax.f32 %v1515_v53, 0.0  ;;  %v1518_v11 = vadd.f32 %v2137_v7, %v1229_v56  ;;  %v1238_v63 = vpop.f32.mrb[59].mxu0  ;;  %v1509_v12 = vpop.f32.mrb[59].mxu1  ;;  %v1237_v57 = vadd.f32 %v3037_v59, %v1236_v13 }
 0x1f8   : > { %v1689_v32 = vmax.f32 %v1507_v3, 0.0  ;;  %v1510_v33 = vadd.f32 %v1509_v12, %v1221_v45 }
 0x1f9   : > { %1755 = vst [vmem:[%s3050_s22 + $0xd0] sm:$0xff] %v1691_v8  ;;  %v1692_v0 = vmax.f32 %v1518_v11, 0.0 }
 0x1fa   : > { %1753 = vst [vmem:[%s3050_s22 + $0xc0] sm:$0xff] %v1689_v32  ;;  %v1690_v19 = vmax.f32 %v1510_v33, 0.0 }
 0x1fb   : > { %1756 = vst [vmem:[%s3050_s22 + $0xd8] sm:$0xff] %v1692_v0 }
 0x1fc   : > { %1754 = vst [vmem:[%s3050_s22 + $0xc8] sm:$0xff] %v1690_v19  ;;  %v1241_v20 = vpop.f32.mrb[60].mxu0  ;;  %v2140_v15 = vpop.f32.mrb[60].mxu1 }
 0x1fd   : > { %v1242_v23 = vadd.f32 %v3037_v59, %v1241_v20  ;;  %v1243_v24 = vpop.f32.mrb[61].mxu0  ;;  %v1522_v47 = vpop.f32.mrb[61].mxu1 }
 0x1fe   : > { %v1523_v27 = vadd.f32 %v1522_v47, %v1234_v25  ;;  %v1244_v16 = vpop.f32.mrb[62].mxu0  ;;  %v2141_v5 = vpop.f32.mrb[62].mxu1 }
 0x1ff   : > { %v1531_v37 = vadd.f32 %v2140_v15, %v1242_v23  ;;  %v1245_v61 = vadd.f32 %v3037_v59, %v1244_v16  ;;  %v1246_v28 = vpop.f32.mrb[63].mxu0  ;;  %v1525_v29 = vpop.f32.mrb[63].mxu1 }
 0x200   : > { %v1693_v35 = vmax.f32 %v1523_v27, 0.0  ;;  %v1526_v36 = vadd.f32 %v1525_v29, %v1237_v57 }
 0x201   : > { %v1695_v39 = vmax.f32 %v1531_v37, 0.0  ;;  %v1534_v31 = vadd.f32 %v2141_v5, %v1245_v61 }
 0x202   : > { %1757 = vst [vmem:[%s3050_s22 + $0xe0] sm:$0xff] %v1693_v35  ;;  %v1694_v40 = vmax.f32 %v1526_v36, 0.0 }
 0x203   : > { %1759 = vst [vmem:[%s3050_s22 + $0xf0] sm:$0xff] %v1695_v39  ;;  %v1696_v43 = vmax.f32 %v1534_v31, 0.0 }
 0x204   : > { %1758 = vst [vmem:[%s3050_s22 + $0xe8] sm:$0xff] %v1694_v40  ;;  %v1249_v4 = vpop.f32.mrb[64].mxu0  ;;  %v2144_v17 = vpop.f32.mrb[64].mxu1 }
 0x205   : > { %1760 = vst [vmem:[%s3050_s22 + $0xf8] sm:$0xff] %v1696_v43  ;;  %v1250_v49 = vadd.f32 %v3037_v59, %v1249_v4  ;;  %v1251_v9 = vpop.f32.mrb[65].mxu0  ;;  %v1538_v41 = vpop.f32.mrb[65].mxu1 }
 0x206   : > { %v1252_v44 = vpop.f32.mrb[66].mxu0  ;;  %v2145_v48 = vpop.f32.mrb[66].mxu1 }
 0x207   : > { %v1539_v51 = vadd.f32 %v1538_v41, %v1250_v49  ;;  %v1253_v52 = vadd.f32 %v3037_v59, %v1252_v44  ;;  %v1254_v1 = vpop.f32.mrb[67].mxu0  ;;  %v1541_v55 = vpop.f32.mrb[67].mxu1 }
 0x209   : > { %v1697_v56 = vmax.f32 %v1539_v51, 0.0  ;;  %v1542_v53 = vadd.f32 %v1541_v55, %v1253_v52  ;;  %v1322_v52 = vadd.f32 %v3037_v59, %v2985_v2  ;;  %v1314_v55 = vadd.f32 %v3037_v59, %v2979_v58 }
 0x20a   : > { %v1317_v2 = vadd.f32 %v3037_v59, %v2983_v62 }
 0x20b   : > { %1761 = vst [vmem:[%s3050_s22 + $0x100] sm:$0xff] %v1697_v56  ;;  %v1698_v60 = vmax.f32 %v1542_v53, 0.0 }
 0x20c   : > { %v1257_v21 = vpop.f32.mrb[68].mxu0  ;;  %v2148_v45 = vpop.f32.mrb[68].mxu1 }
 0x20d   : > { %1762 = vst [vmem:[%s3050_s22 + $0x108] sm:$0xff] %v1698_v60  ;;  %v1258_v3 = vadd.f32 %v3037_v59, %v1257_v21  ;;  %v1259_v13 = vpop.f32.mrb[69].mxu0  ;;  %v1554_v7 = vpop.f32.mrb[69].mxu1  ;;  %v1325_v60 = vadd.f32 %v3037_v59, %v2987_v6 }
 0x20e   : > { %v1260_v8 = vpop.f32.mrb[70].mxu0  ;;  %v2149_v11 = vpop.f32.mrb[70].mxu1 }
 0x20f   : > { %v1547_v63 = vadd.f32 %v2144_v17, %v1258_v3  ;;  %v1261_v12 = vadd.f32 %v3037_v59, %v1260_v8  ;;  %v1262_v32 = vpop.f32.mrb[71].mxu0  ;;  %v1557_v33 = vpop.f32.mrb[71].mxu1 }
 0x211   : > { %v1699_v0 = vmax.f32 %v1547_v63, 0.0  ;;  %v1550_v19 = vadd.f32 %v2145_v48, %v1261_v12 }
 0x213   : > { %1763 = vst [vmem:[%s3050_s22 + $0x110] sm:$0xff] %v1699_v0  ;;  %v1700_v25 = vmax.f32 %v1550_v19, 0.0 }
 0x214   : > { %v1265_v20 = vpop.f32.mrb[72].mxu0  ;;  %v3145_v15 = vpop.f32.mrb[72].mxu1 }
 0x215   : > { %1764 = vst [vmem:[%s3050_s22 + $0x118] sm:$0xff] %v1700_v25  ;;  %v1266_v23 = vadd.f32 %v3037_v59, %v1265_v20  ;;  %v1267_v24 = vpop.f32.mrb[73].mxu0  ;;  %v1570_v47 = vpop.f32.mrb[73].mxu1 }
 0x216   : > { %v1268_v57 = vpop.f32.mrb[74].mxu0  ;;  %v3149_v27 = vpop.f32.mrb[74].mxu1  ;;  %v1338_v24 = vadd.f32 %v3037_v59, %v2999_v18  ;;  %v1333_v18 = vadd.f32 %v3037_v59, %v2995_v14 }
 0x217   : > { %v1555_v16 = vadd.f32 %v1554_v7, %v1266_v23  ;;  %v1269_v5 = vadd.f32 %v3037_v59, %v1268_v57  ;;  %v1270_v37 = vpop.f32.mrb[75].mxu0  ;;  %v1573_v61 = vpop.f32.mrb[75].mxu1  ;;  %v1330_v57 = vadd.f32 %v3037_v59, %v2991_v10 }
 0x218   : > { %v1341_v37 = vadd.f32 %v3037_v59, %v3003_v22 }
 0x219   : > { %v1701_v28 = vmax.f32 %v1555_v16, 0.0  ;;  %v1558_v29 = vadd.f32 %v1557_v33, %v1269_v5 }
 0x21b   : > { %1765 = vst [vmem:[%s3050_s22 + $0x120] sm:$0xff] %v1701_v28  ;;  %v1702_v35 = vmax.f32 %v1558_v29, 0.0 }
 0x21c   : > { %v1273_v36 = vpop.f32.mrb[76].mxu0  ;;  %v3153_v39 = vpop.f32.mrb[76].mxu1 }
 0x21d   : > { %1766 = vst [vmem:[%s3050_s22 + $0x128] sm:$0xff] %v1702_v35  ;;  %v1274_v31 = vadd.f32 %v3037_v59, %v1273_v36  ;;  %v1275_v40 = vpop.f32.mrb[77].mxu0  ;;  %v3157_v43 = vpop.f32.mrb[77].mxu1 }
 0x21e   : > { %v1276_v4 = vpop.f32.mrb[78].mxu0  ;;  %v3159_v17 = vpop.f32.mrb[78].mxu1 }
 0x21f   : > { %v1563_v49 = vadd.f32 %v2148_v45, %v1274_v31  ;;  %v1277_v9 = vadd.f32 %v3037_v59, %v1276_v4  ;;  %v1278_v41 = vpop.f32.mrb[79].mxu0  ;;  %v3162_v44 = vpop.f32.mrb[79].mxu1 }
 0x221   : > { %v1703_v48 = vmax.f32 %v1563_v49, 0.0  ;;  %v1566_v51 = vadd.f32 %v2149_v11, %v1277_v9 }
 0x223   : > { %1767 = vst [vmem:[%s3050_s22 + $0x130] sm:$0xff] %v1703_v48  ;;  %v1704_v1 = vmax.f32 %v1566_v51, 0.0 }
 0x224   : > { %v1281_v56 = vpop.f32.mrb[80].mxu0  ;;  %v2160_v53 = vpop.f32.mrb[80].mxu1 }
 0x225   : > { %1768 = vst [vmem:[%s3050_s22 + $0x138] sm:$0xff] %v1704_v1  ;;  %v1282_v21 = vadd.f32 %v3037_v59, %v1281_v56  ;;  %v1611_v45 = vadd.f32 %v2160_v53, %v1322_v52  ;;  %v1283_v3 = vpop.f32.mrb[81].mxu0  ;;  %v1602_v13 = vpop.f32.mrb[81].mxu1  ;;  %v1346_v53 = vadd.f32 %v3037_v59, %v3007_v26 }
 0x226   : > { %v1603_v7 = vadd.f32 %v1602_v13, %v1314_v55  ;;  %v1284_v8 = vpop.f32.mrb[82].mxu0  ;;  %v2161_v11 = vpop.f32.mrb[82].mxu1 }
 0x227   : > { %v1571_v58 = vadd.f32 %v1570_v47, %v1282_v21  ;;  %v1715_v63 = vmax.f32 %v1611_v45, 0.0  ;;  %v1285_v6 = vadd.f32 %v3037_v59, %v1284_v8  ;;  %v1614_v12 = vadd.f32 %v2161_v11, %v1325_v60  ;;  %v1286_v32 = vpop.f32.mrb[83].mxu0  ;;  %v1605_v33 = vpop.f32.mrb[83].mxu1 }
 0x228   : > { %v1713_v0 = vmax.f32 %v1603_v7, 0.0  ;;  %v1606_v19 = vadd.f32 %v1605_v33, %v1317_v2  ;;  %v1357_v45 = vadd.f32 %v3037_v59, %v3019_v38 }
 0x229   : > { %v1705_v25 = vmax.f32 %v1571_v58, 0.0  ;;  %1779 = vst [vmem:[%s3050_s22 + $0x190] sm:$0xff] %v1715_v63  ;;  %v1574_v62 = vadd.f32 %v1573_v61, %v1285_v6  ;;  %v1716_v20 = vmax.f32 %v1614_v12, 0.0 }
 0x22a   : > { %1777 = vst [vmem:[%s3050_s22 + $0x180] sm:$0xff] %v1713_v0  ;;  %v1714_v23 = vmax.f32 %v1606_v19, 0.0 }
 0x22b   : > { %1769 = vst [vmem:[%s3050_s22 + $0x140] sm:$0xff] %v1705_v25  ;;  %v1706_v47 = vmax.f32 %v1574_v62, 0.0  ;;  %1780 = vst [vmem:[%s3050_s22 + $0x198] sm:$0xff] %v1716_v20  ;;  %v1362_v20 = vadd.f32 %v3037_v59, %v3023_v42 }
 0x22c   : > { %1778 = vst [vmem:[%s3050_s22 + $0x188] sm:$0xff] %v1714_v23  ;;  %v1289_v16 = vpop.f32.mrb[84].mxu0  ;;  %v2164_v5 = vpop.f32.mrb[84].mxu1 }
 0x22d   : > { %1770 = vst [vmem:[%s3050_s22 + $0x148] sm:$0xff] %v1706_v47  ;;  %v1290_v61 = vadd.f32 %v3037_v59, %v1289_v16  ;;  %v1627_v28 = vadd.f32 %v2164_v5, %v1338_v24  ;;  %v1291_v29 = vpop.f32.mrb[85].mxu0  ;;  %v1618_v35 = vpop.f32.mrb[85].mxu1  ;;  %v1373_v47 = vadd.f32 %v3037_v59, %v3035_v54  ;;  %v1365_v5 = vadd.f32 %v3037_v59, %v3027_v46 }
 0x22e   : > { %v1619_v36 = vadd.f32 %v1618_v35, %v1330_v57  ;;  %v1292_v31 = vpop.f32.mrb[86].mxu0  ;;  %v2165_v10 = vpop.f32.mrb[86].mxu1 }
 0x22f   : > { %v1579_v40 = vadd.f32 %v3145_v15, %v1290_v61  ;;  %v1719_v4 = vmax.f32 %v1627_v28, 0.0  ;;  %v1293_v22 = vadd.f32 %v3037_v59, %v1292_v31  ;;  %v1630_v49 = vadd.f32 %v2165_v10, %v1341_v37  ;;  %v1294_v9 = vpop.f32.mrb[87].mxu0  ;;  %v1621_v41 = vpop.f32.mrb[87].mxu1 }
 0x230   : > { %v1717_v48 = vmax.f32 %v1619_v36, 0.0  ;;  %v1622_v51 = vadd.f32 %v1621_v41, %v1333_v18  ;;  %v1354_v15 = vadd.f32 %v3037_v59, %v3015_v34  ;;  %v1349_v34 = vadd.f32 %v3037_v59, %v3011_v30 }
 0x231   : > { %v1707_v52 = vmax.f32 %v1579_v40, 0.0  ;;  %1783 = vst [vmem:[%s3050_s22 + $0x1b0] sm:$0xff] %v1719_v4  ;;  %v1582_v14 = vadd.f32 %v3149_v27, %v1293_v22  ;;  %v1720_v1 = vmax.f32 %v1630_v49, 0.0 }
 0x232   : > { %1781 = vst [vmem:[%s3050_s22 + $0x1a0] sm:$0xff] %v1717_v48  ;;  %v1718_v55 = vmax.f32 %v1622_v51, 0.0 }
 0x233   : > { %1771 = vst [vmem:[%s3050_s22 + $0x150] sm:$0xff] %v1707_v52  ;;  %v1708_v56 = vmax.f32 %v1582_v14, 0.0  ;;  %1784 = vst [vmem:[%s3050_s22 + $0x1b8] sm:$0xff] %v1720_v1 }
 0x234   : > { %1782 = vst [vmem:[%s3050_s22 + $0x1a8] sm:$0xff] %v1718_v55  ;;  %v1297_v60 = vpop.f32.mrb[88].mxu0  ;;  %v2168_v21 = vpop.f32.mrb[88].mxu1 }
 0x235   : > { %1772 = vst [vmem:[%s3050_s22 + $0x158] sm:$0xff] %v1708_v56  ;;  %v1298_v27 = vadd.f32 %v3037_v59, %v1297_v60  ;;  %v1643_v3 = vadd.f32 %v2168_v21, %v1354_v15  ;;  %v1299_v13 = vpop.f32.mrb[89].mxu0  ;;  %v1634_v2 = vpop.f32.mrb[89].mxu1 }
 0x236   : > { %v1635_v7 = vadd.f32 %v1634_v2, %v1346_v53  ;;  %v1300_v8 = vpop.f32.mrb[90].mxu0  ;;  %v2169_v26 = vpop.f32.mrb[90].mxu1 }
 0x237   : > { %v1587_v11 = vadd.f32 %v3157_v43, %v1298_v27  ;;  %v1723_v58 = vmax.f32 %v1643_v3, 0.0  ;;  %v1301_v38 = vadd.f32 %v3037_v59, %v1300_v8  ;;  %v1646_v63 = vadd.f32 %v2169_v26, %v1357_v45  ;;  %v1302_v6 = vpop.f32.mrb[91].mxu0  ;;  %v1637_v12 = vpop.f32.mrb[91].mxu1 }
 0x238   : > { %v1721_v32 = vmax.f32 %v1635_v7, 0.0  ;;  %v1638_v33 = vadd.f32 %v1637_v12, %v1349_v34  ;;  %v1370_v43 = vadd.f32 %v3037_v59, %v3031_v50 }
 0x239   : > { %v1709_v0 = vmax.f32 %v1587_v11, 0.0  ;;  %1787 = vst [vmem:[%s3050_s22 + $0x1d0] sm:$0xff] %v1723_v58  ;;  %v1590_v30 = vadd.f32 %v3162_v44, %v1301_v38  ;;  %v1724_v19 = vmax.f32 %v1646_v63, 0.0 }
 0x23a   : > { %1785 = vst [vmem:[%s3050_s22 + $0x1c0] sm:$0xff] %v1721_v32  ;;  %v1722_v25 = vmax.f32 %v1638_v33, 0.0 }
 0x23b   : > { %1773 = vst [vmem:[%s3050_s22 + $0x160] sm:$0xff] %v1709_v0  ;;  %v1710_v62 = vmax.f32 %v1590_v30, 0.0  ;;  %1788 = vst [vmem:[%s3050_s22 + $0x1d8] sm:$0xff] %v1724_v19 }
 0x23c   : > { %1786 = vst [vmem:[%s3050_s22 + $0x1c8] sm:$0xff] %v1722_v25  ;;  %v1305_v23 = vpop.f32.mrb[92].mxu0  ;;  %v2172_v24 = vpop.f32.mrb[92].mxu1 }
 0x23d   : > { %1774 = vst [vmem:[%s3050_s22 + $0x168] sm:$0xff] %v1710_v62  ;;  %v1306_v44 = vadd.f32 %v3037_v59, %v1305_v23  ;;  %v1659_v57 = vadd.f32 %v2172_v24, %v1370_v43  ;;  %v1307_v16 = vpop.f32.mrb[93].mxu0  ;;  %v1650_v50 = vpop.f32.mrb[93].mxu1 }
 0x23e   : > { %v1651_v37 = vadd.f32 %v1650_v50, %v1362_v20  ;;  %v1308_v42 = vpop.f32.mrb[94].mxu0  ;;  %v2173_v61 = vpop.f32.mrb[94].mxu1 }
 0x23f   : > { %v1595_v28 = vadd.f32 %v3153_v39, %v1306_v44  ;;  %v1727_v29 = vmax.f32 %v1659_v57, 0.0  ;;  %v1309_v54 = vadd.f32 %v3037_v59, %v1308_v42  ;;  %v1662_v35 = vadd.f32 %v2173_v61, %v1373_v47  ;;  %v1310_v18 = vpop.f32.mrb[95].mxu0  ;;  %v1653_v36 = vpop.f32.mrb[95].mxu1 }
 0x240   : > { %v1725_v46 = vmax.f32 %v1651_v37, 0.0  ;;  %v1654_v31 = vadd.f32 %v1653_v36, %v1365_v5 }
 0x241   : > { %v1711_v10 = vmax.f32 %v1595_v28, 0.0  ;;  %1791 = vst [vmem:[%s3050_s22 + $0x1f0] sm:$0xff] %v1727_v29  ;;  %v1598_v39 = vadd.f32 %v3159_v17, %v1309_v54  ;;  %v1728_v40 = vmax.f32 %v1662_v35, 0.0 }
 0x242   : > { %1789 = vst [vmem:[%s3050_s22 + $0x1e0] sm:$0xff] %v1725_v46  ;;  %v1726_v59 = vmax.f32 %v1654_v31, 0.0 }
 0x243   : > { %1775 = vst [vmem:[%s3050_s22 + $0x170] sm:$0xff] %v1711_v10  ;;  %v1712_v4 = vmax.f32 %v1598_v39, 0.0  ;;  %1792 = vst [vmem:[%s3050_s22 + $0x1f8] sm:$0xff] %v1728_v40 }
 0x244   : > { %1790 = vst [vmem:[%s3050_s22 + $0x1e8] sm:$0xff] %v1726_v59 }
 0x245   : > { %1776 = vst [vmem:[%s3050_s22 + $0x178] sm:$0xff] %v1712_v4 }
 0x246   : > { %2550 = shalt.err (!%p2547_p5)
}
 0x247   : > { %s2551_s10 = scalar_lea.hbm %s3237_s9, 8192  ;;  %s2555_s29 = scalar_lea.hbm %s3294_s3, 114688 }
 0x248   : > { %p2552_p9 = scmp.ne.s32.totalorder %s3237_s9, %s2551_s10  ;;  %p2556_p3 = scmp.lt.u32.totalorder %s3237_s9, %s3294_s3 }
 0x249   : > { %p2557_p7 = scmp.lt.u32.totalorder %s2555_s29, %s2551_s10  ;;  %p2559_p1 = scmp.lt.u32.totalorder %s2551_s10, %s3237_s9 }
 0x24a   : > { %p2553_p12 = pnand %p2552_p9, %p2782_p8 }
 0x24b   : > { %p2558_p10 = por %p2557_p7, %p2556_p3 }
 0x24c   : > { %p2554_p11 = pneg %p2553_p12 }
 0x24d   : > { %p2560_p2 = por %p2559_p1, %p2558_p10 }
 0x24f   : > { %p2561_p4 = pnand %p2560_p2, %p2554_p11 }
 0x251   : > { %2564 = shalt.err (!%p2561_p4)
}
 0x252   : > { %s2634_s22 = smov 128   ;;  %s2635_s24 = smov 8  }
 0x253   : > { %2219 = dma.vmem_to_hbm [thread:$0]  (%p2782_p8), %s3239_s30, 8192, %s3237_s9, %s1794_s15, %s2634_s22, %s2634_s22, %s2635_s24  }
 0x254 PF: > { %p2241_p6 = scmp.ge.s32.totalorder %s2623_s17, 2  ;;  %s1823_s7 = sand.u32 1, %s2603_s12  }
 0x255   : > { %p3311_p13 = scmp.ne.s32.totalorder %s3302_s23, 0  ;;  %s1824_s26 = scalar_lea.sflag [#allocation4], %s1823_s7 }
 0x257   : > { %p2233_p0 = pnand %p2241_p6, %p3311_p13 }
 0x259   : > { %2598 = dma.done.wait (!%p2233_p0), %s1824_s26, 8192  }
 0x25a   : > { %2600 = vsyncadd (!%p2233_p0), %s1824_s26, 4294959104  ;;  %s20_s17 = sadd.s32 1, %s2623_s17   ;;  %s3312_s12 = smov %s2607_s13 }
 0x25b   : > { %p17_p5 = scmp.ge.s32.totalorder %s20_s17, 16   ;;  %s3313_s13 = smov %s2611_s14 }
 0x25c   : > { %s3314_s14 = smov %s2794_s4  ;;  %s3315_s15 = smov %s2619_s16 }
 0x25d   : > { %s3316_s16 = smov %s3318_s18  ;;  %19 = sbr.rel (!%p17_p5) target bundleno = 7 (0x7), region = 87 }
 0x264   :  { %1829 = vsyncpa [#allocation3], 1 }
 0x265   :  { %1831 = vsyncpa [#allocation3 + $0x1], 1 }
 0x266   :  { %1832 = vsyncpa [#allocation6], 1 }
 0x267   :  { %1833 = vsyncpa [#allocation4], 1 }
 0x268   :  { %1835 = vsyncpa [#allocation4 + $0x1], 1 }

</bundles_post_ra>
